<compile_context>
chip_gen: v6e
topology: v6e:2x2x1
jax: 0.10.0
libtpu: 0.0.40
codegen_flags: <defaults>
</compile_context>

<pallas_src>
import functools
import math

import jax
import jax.numpy as jnp
import numpy as np
from jax.experimental import pallas as pl
from jax.experimental.pallas import tpu as pltpu

GN_EPS = 1e-10
GROUP_NUM = 32
# <= v7x physical VMEM (64 MiB per TensorCore); generous on v5e/v6e (128 MiB).
VMEM_LIMIT_BYTES = 48 * 1024 * 1024


# -----------------------------------------------------------------------------
# Shared GroupBatchnorm2d (+conv bias, +ReLU) epilogue.  Runs in f32 on the
# per-sample accumulator tile.  Torch semantics: per-(sample, group) mean and
# *unbiased* std, divide by (std + eps), then per-channel gamma/beta.
# Two-pass (subtract-mean) variance avoids E[x^2]-E[x]^2 cancellation.
# The (1, CoT) @ (CoT, CoT) same-group-indicator matmul broadcasts group
# statistics back to channels (groups never straddle a Cout tile here).
# -----------------------------------------------------------------------------
def _gn_relu(acc, b, gamma, beta, P, group_ch, eps):
    HW = acc.shape[0]
    cnt = float(group_ch * HW)
    x = acc + b                                                     # conv bias
    ch_sum = jnp.sum(x, axis=0, keepdims=True)                      # (1, CoT)
    mean = jnp.dot(ch_sum, P, preferred_element_type=jnp.float32) / cnt
    d = x - mean
    ssd = jnp.sum(d * d, axis=0, keepdims=True)                     # (1, CoT)
    var = jnp.dot(ssd, P, preferred_element_type=jnp.float32) / (cnt - 1.0)
    std = jnp.sqrt(jnp.maximum(var, 0.0))
    a = gamma / (std + eps)          # tiny (1, CoT): exact divide, hoisted
    return jnp.maximum(d * a + beta, 0.0)                           # ReLU


# -----------------------------------------------------------------------------
# Kernel 1: dilated 3x3 conv (9 taps, one bf16 MXU matmul per grid step into an
# f32 accumulator) + GroupBatchnorm + ReLU, finalized at the last tap.
# -----------------------------------------------------------------------------
def _conv3x3_gn_relu_kernel(x_ref, w_ref, b_ref, g_ref, bt_ref, p_ref,
                            o_ref, acc_ref, *, group_ch, eps):
    k = pl.program_id(2)

    @pl.when(k == 0)
    def _():
        acc_ref[...] = jnp.zeros_like(acc_ref)

    # bf16 x bf16 -> f32 accumulate on the MXU.
    acc_ref[...] += jnp.dot(x_ref[0, 0], w_ref[0],
                            preferred_element_type=jnp.float32)

    @pl.when(k == pl.num_programs(2) - 1)
    def _():
        y = _gn_relu(acc_ref[...], b_ref[...], g_ref[...], bt_ref[...],
                     p_ref[...], group_ch, eps)
        o_ref[0] = y.astype(o_ref.dtype)


# Same as above, but with the 1x1 `self.out` conv (Cout=2) fused into the
# epilogue, so the 128-channel activation never round-trips through HBM.
def _conv3x3_gn_relu_out_kernel(x_ref, w_ref, b_ref, g_ref, bt_ref, p_ref,
                                wo_ref, bo_ref, o_ref, acc_ref,
                                *, group_ch, eps):
    k = pl.program_id(2)

    @pl.when(k == 0)
    def _():
        acc_ref[...] = jnp.zeros_like(acc_ref)

    acc_ref[...] += jnp.dot(x_ref[0, 0], w_ref[0],
                            preferred_element_type=jnp.float32)

    @pl.when(k == pl.num_programs(2) - 1)
    def _():
        y = _gn_relu(acc_ref[...], b_ref[...], g_ref[...], bt_ref[...],
                     p_ref[...], group_ch, eps)
        o_ref[0] = (jnp.dot(y, wo_ref[...], preferred_element_type=jnp.float32)
                    + bo_ref[...])


def _im2col(x_nhwc, dil):
    """(N,H,W,C) -> (N, 9, H*W, C) bf16 tap stack for a dilated 3x3, pad=dil."""
    N, H, W, C = x_nhwc.shape
    p = dil
    xp = jnp.pad(x_nhwc, ((0, 0), (p, p), (p, p), (0, 0)))
    taps = [xp[:, kh * dil:kh * dil + H, kw * dil:kw * dil + W, :]
            for kh in range(3) for kw in range(3)]
    return jnp.stack(taps, axis=1).reshape(N, 9, H * W, C).astype(jnp.bfloat16)


def conv3x3_gn_relu(x_nhwc, layer, *, dil, group_ch, out_conv=None):
    N, H, W, Cin = x_nhwc.shape
    w9 = layer["w"]                                     # (9, Cin, Cout) bf16
    Cout = w9.shape[-1]
    HW = H * W
    # 256-wide Cout tile fills the 256-wide v6e/v7x MXU; groups stay inside a tile.
    co_tile = 256 if Cout % 256 == 0 else min(128, Cout)
    assert co_tile % group_ch == 0 and Cin % 128 == 0 and HW % 8 == 0

    x_col = _im2col(x_nhwc, dil)

    grid = (N, Cout // co_tile, 9)                      # taps innermost (reduction)
    in_specs = [
        pl.BlockSpec((1, 1, HW, Cin), lambda n, j, k: (n, k, 0, 0)),
        pl.BlockSpec((1, Cin, co_tile), lambda n, j, k: (k, 0, j)),
        pl.BlockSpec((1, co_tile), lambda n, j, k: (0, j)),
        pl.BlockSpec((1, co_tile), lambda n, j, k: (0, j)),
        pl.BlockSpec((1, co_tile), lambda n, j, k: (0, j)),
        pl.BlockSpec((co_tile, co_tile), lambda n, j, k: (j, j)),
    ]
    args = [x_col, layer["w"], layer["b"], layer["gamma"], layer["beta"],
            layer["P"]]

    if out_conv is None:
        kernel = functools.partial(_conv3x3_gn_relu_kernel,
                                   group_ch=group_ch, eps=GN_EPS)
        out_shape = jax.ShapeDtypeStruct((N, HW, Cout), jnp.bfloat16)
        out_specs = pl.BlockSpec((1, HW, co_tile), lambda n, j, k: (n, 0, j))
        out_bytes = N * HW * Cout * 2
    else:
        w_out, b_out = out_conv
        n_cls = w_out.shape[1]
        assert Cout == co_tile, "fused out-conv needs Cout within one tile"
        kernel = functools.partial(_conv3x3_gn_relu_out_kernel,
                                   group_ch=group_ch, eps=GN_EPS)
        in_specs = in_specs + [
            pl.BlockSpec((Cout, n_cls), lambda n, j, k: (0, 0)),
            pl.BlockSpec((1, n_cls), lambda n, j, k: (0, 0)),
        ]
        args = args + [w_out, b_out]
        out_shape = jax.ShapeDtypeStruct((N, HW, n_cls), jnp.float32)
        out_specs = pl.BlockSpec((1, HW, n_cls), lambda n, j, k: (n, 0, 0))
        out_bytes = N * HW * n_cls * 4

    cost = pl.CostEstimate(
        flops=int(2 * 9 * N * HW * Cin * Cout + 8 * N * HW * Cout),
        transcendentals=0,
        bytes_accessed=int(N * 9 * HW * Cin * 2 + 9 * Cin * Cout * 2
                           + Cout * Cout * 4 + out_bytes))

    y = pl.pallas_call(
        kernel,
        out_shape=out_shape,
        grid=grid,
        in_specs=in_specs,
        out_specs=out_specs,
        scratch_shapes=[pltpu.VMEM((HW, co_tile), jnp.float32)],
        compiler_params=pltpu.CompilerParams(
            dimension_semantics=("parallel", "parallel", "arbitrary"),
            vmem_limit_bytes=VMEM_LIMIT_BYTES),
        cost_estimate=cost,
    )(*args)
    return y.reshape(N, H, W, -1)


# -----------------------------------------------------------------------------
# Kernel 2: three stacked UpsamplingBilinear2d(scale_factor=2) (align_corners).
# Composition of the three separable linear maps: out[n,c] = Ah @ x[n,c] @ Aw^T
# with Ah/Aw precomputed on host.  W-contraction is batched over all (c, h)
# rows for a lane-dense matmul; the H-contraction is a tiny static loop (C=2).
# -----------------------------------------------------------------------------
def _upsample_kernel(ah_ref, awt_ref, x_ref, o_ref):
    _, C, H, W = x_ref.shape
    Wo = awt_ref.shape[1]
    x = x_ref[0]                                                    # (C, H, W)
    t = jnp.dot(x.reshape(C * H, W), awt_ref[...],
                preferred_element_type=jnp.float32).reshape(C, H, Wo)
    ah = ah_ref[...]
    for c in range(C):                        # C == num_classes == 2
        o_ref[0, c] = jnp.dot(ah, t[c], preferred_element_type=jnp.float32)


def upsample_x8(x_nchw, Ah, AwT):
    N, C, H, W = x_nchw.shape
    Ho, Wo = Ah.shape[0], AwT.shape[1]
    return pl.pallas_call(
        _upsample_kernel,
        out_shape=jax.ShapeDtypeStruct((N, C, Ho, Wo), jnp.float32),
        grid=(N,),
        in_specs=[
            pl.BlockSpec(tuple(Ah.shape), lambda n: (0, 0)),
            pl.BlockSpec(tuple(AwT.shape), lambda n: (0, 0)),
            pl.BlockSpec((1, C, H, W), lambda n: (n, 0, 0, 0)),
        ],
        out_specs=pl.BlockSpec((1, C, Ho, Wo), lambda n: (n, 0, 0, 0)),
        compiler_params=pltpu.CompilerParams(
            dimension_semantics=("parallel",),
            vmem_limit_bytes=VMEM_LIMIT_BYTES),
    )(Ah, AwT, x_nchw)


# -----------------------------------------------------------------------------
# Parameter construction (mirrors _initialize_weights: conv W ~ N(0, sqrt(2/(k*k*Cout))),
# conv bias = 0, GN gamma = 1, GN beta = 0).  Conv weights stored as a bf16
# (9, Cin, Cout) tap stack for the MXU; GN/bias/P stay f32.
# -----------------------------------------------------------------------------
def _group_indicator(cout, group_num=GROUP_NUM):
    gch = cout // group_num
    gid = np.arange(cout) // gch
    return jnp.asarray((gid[:, None] == gid[None, :]).astype(np.float32))


def _bilinear_matrix(out_size, in_size):
    # PyTorch UpsamplingBilinear2d == bilinear interpolate with align_corners=True.
    A = np.zeros((out_size, in_size), np.float32)
    for i in range(out_size):
        src = i * (in_size - 1) / (out_size - 1) if out_size > 1 else 0.0
        i0 = min(int(np.floor(src)), in_size - 1)
        i1 = min(i0 + 1, in_size - 1)
        frac = src - i0
        A[i, i0] += 1.0 - frac
        A[i, i1] += frac
    return A


def _upsample_matrix_x8(size):
    s1, s2, s3 = size * 2, size * 4, size * 8
    A = (_bilinear_matrix(s3, s2) @ _bilinear_matrix(s2, s1)
         @ _bilinear_matrix(s1, size))
    return A.astype(np.float32)


def init_params(key, H, W=None):
    if W is None:
        W = H
    ks = jax.random.split(key, 6)

    def conv_w(k, cin, cout, ksize=3):
        n = ksize * ksize * cout
        w = (jax.random.normal(k, (ksize, ksize, cin, cout), jnp.float32)
             * math.sqrt(2.0 / n))
        return w.reshape(ksize * ksize, cin, cout).astype(jnp.bfloat16)

    def gn_block(k, cin, cout):
        return dict(
            w=conv_w(k, cin, cout),
            b=jnp.zeros((1, cout), jnp.float32),
            gamma=jnp.ones((1, cout), jnp.float32),
            beta=jnp.zeros((1, cout), jnp.float32),
            P=_group_indicator(cout),
        )

    return {
        "conv5": [gn_block(ks[0], 512, 512),
                  gn_block(ks[1], 512, 512),
                  gn_block(ks[2], 512, 512)],
        "fc1": [gn_block(ks[3], 512, 1024),
                gn_block(ks[4], 1024, 128)],
        "out_w": jax.random.normal(ks[5], (128, 2), jnp.float32)
                 * math.sqrt(2.0 / (1 * 1 * 2)),
        "out_b": jnp.zeros((1, 2), jnp.float32),
        "Ah": jnp.asarray(_upsample_matrix_x8(H)),
        "AwT": jnp.asarray(_upsample_matrix_x8(W).T),
    }


# -----------------------------------------------------------------------------
# Forward pass (matches VGG_gn.forward).
# -----------------------------------------------------------------------------
def vgg_gn_forward(x_nchw, params):
    # TODO(synk): `self.features` is an externally injected backbone (not defined in
    # this module) -> treated as identity; input is already the 512-ch feature map.
    # `self.scnn` is constructed in __init__ but never used in forward;
    # nn.Dropout2d(0.1) is inference-mode identity.
    x = jnp.transpose(x_nchw, (0, 2, 3, 1)).astype(jnp.bfloat16)   # NCHW -> NHWC bf16

    for layer in params["conv5"]:                                  # 3x (conv d2 + GN + ReLU)
        x = conv3x3_gn_relu(x, layer, dil=2, group_ch=512 // GROUP_NUM)

    l0, l1 = params["fc1"]                                         # fc1
    x = conv3x3_gn_relu(x, l0, dil=4, group_ch=1024 // GROUP_NUM)
    # Last fc1 layer with the 1x1 `self.out` conv fused into its epilogue.
    y = conv3x3_gn_relu(x, l1, dil=1, group_ch=128 // GROUP_NUM,
                        out_conv=(params["out_w"], params["out_b"]))

    y = jnp.transpose(y, (0, 3, 1, 2))                             # NHWC -> NCHW
    y = upsample_x8(y, params["Ah"], params["AwT"])                # up, up, up (x8)
    return y


if __name__ == "__main__":
    N, H, W = 2, 8, 8
    key = jax.random.PRNGKey(0)
    kx, kp = jax.random.split(key)
    x = jax.random.normal(kx, (N, 512, H, W), jnp.float32)         # NCHW 512-ch feature map
    params = init_params(kp, H, W)

    out = vgg_gn_forward(x, params)
    out = jax.block_until_ready(out)

    assert out.shape == (N, 2, 8 * H, 8 * W), out.shape
    assert bool(jnp.all(jnp.isfinite(out)))
    print("KERNEL_OK")
</pallas_src>

<mosaic_0001>
module attributes {stable_mosaic.version = 11 : i64} {
  func.func @_conv3x3_gn_relu_kernel(%arg0: i32, %arg1: i32, %arg2: i32, %arg3: memref<1x1x64x512xbf16, #tpu.memory_space<vmem>>, %arg4: memref<1x512x256xbf16, #tpu.memory_space<vmem>>, %arg5: memref<1x256xf32, #tpu.memory_space<vmem>>, %arg6: memref<1x256xf32, #tpu.memory_space<vmem>>, %arg7: memref<1x256xf32, #tpu.memory_space<vmem>>, %arg8: memref<256x256xf32, #tpu.memory_space<vmem>>, %arg9: memref<1x64x256xbf16, #tpu.memory_space<vmem>>, %arg10: memref<64x256xf32, #tpu.memory_space<vmem>>) attributes {dimension_semantics = [#tpu.dimension_semantics<parallel>, #tpu.dimension_semantics<parallel>, #tpu.dimension_semantics<arbitrary>], iteration_bounds = array<i64: 2, 2, 9>, scalar_prefetch = 0 : i64, scratch_operands = 1 : i64, tpu.core_type = #tpu.core_type<tc>, window_params = [{transform_indices = @transform_0, window_bounds = array<i64: 1, 1, 64, 512>}, {transform_indices = @transform_1, window_bounds = array<i64: 1, 512, 256>}, {transform_indices = @transform_2, window_bounds = array<i64: 1, 256>}, {transform_indices = @transform_3, window_bounds = array<i64: 1, 256>}, {transform_indices = @transform_4, window_bounds = array<i64: 1, 256>}, {transform_indices = @transform_5, window_bounds = array<i64: 256, 256>}, {transform_indices = @transform_6, window_bounds = array<i64: 1, 64, 256>}]} {
    %c0_i32 = arith.constant 0 : i32
    %0 = arith.cmpi eq, %arg2, %c0_i32 : i32
    %1 = arith.extui %0 : i1 to i32
    %c0_i32_0 = arith.constant 0 : i32
    %2 = arith.cmpi ne, %1, %c0_i32_0 : i32
    scf.if %2 {
      %cst_12 = arith.constant 0.000000e+00 : f32
      %14 = vector.broadcast %cst_12 : f32 to vector<64x256xf32>
      %c0_13 = arith.constant 0 : index
      %c0_14 = arith.constant 0 : index
      %15 = vector.load %arg10[%c0_13, %c0_14] : memref<64x256xf32, #tpu.memory_space<vmem>>, vector<64x256xf32>
      tpu.vector_store %arg10[%c0_13, %c0_14], %14 {strides = array<i32>} : memref<64x256xf32, #tpu.memory_space<vmem>>, vector<64x256xf32>,
    } else {
    }
    %c0 = arith.constant 0 : index
    %c0_1 = arith.constant 0 : index
    %3 = vector.load %arg10[%c0, %c0_1] : memref<64x256xf32, #tpu.memory_space<vmem>>, vector<64x256xf32>
    %c0_2 = arith.constant 0 : index
    %c0_3 = arith.constant 0 : index
    %c0_4 = arith.constant 0 : index
    %c0_5 = arith.constant 0 : index
    %4 = vector.load %arg3[%c0_2, %c0_3, %c0_4, %c0_5] : memref<1x1x64x512xbf16, #tpu.memory_space<vmem>>, vector<1x1x64x512xbf16>
    %5 = vector.shape_cast %4 : vector<1x1x64x512xbf16> to vector<64x512xbf16>
    %c0_6 = arith.constant 0 : index
    %c0_7 = arith.constant 0 : index
    %c0_8 = arith.constant 0 : index
    %6 = vector.load %arg4[%c0_6, %c0_7, %c0_8] : memref<1x512x256xbf16, #tpu.memory_space<vmem>>, vector<1x512x256xbf16>
    %7 = vector.shape_cast %6 : vector<1x512x256xbf16> to vector<512x256xbf16>
    %cst = arith.constant dense<0.000000e+00> : vector<64x256xf32>
    %8 = tpu.matmul %5, %7, %cst {dimension_numbers = #tpu.dot_dimension_numbers<[1], [0], [0], [1], [0, 0, 1, 1], [], []>} : vector<64x512xbf16>, vector<512x256xbf16>, vector<64x256xf32> -> vector<64x256xf32>
    %9 = arith.addf %3, %8 : vector<64x256xf32>
    %c0_9 = arith.constant 0 : index
    %c0_10 = arith.constant 0 : index
    %10 = vector.load %arg10[%c0_9, %c0_10] : memref<64x256xf32, #tpu.memory_space<vmem>>, vector<64x256xf32>
    tpu.vector_store %arg10[%c0_9, %c0_10], %9 {strides = array<i32>} : memref<64x256xf32, #tpu.memory_space<vmem>>, vector<64x256xf32>,
    %c8_i32 = arith.constant 8 : i32
    %11 = arith.cmpi eq, %arg2, %c8_i32 : i32
    %12 = arith.extui %11 : i1 to i32
    %c0_i32_11 = arith.constant 0 : i32
    %13 = arith.cmpi ne, %12, %c0_i32_11 : i32
    scf.if %13 {
      %c0_12 = arith.constant 0 : index
      %c0_13 = arith.constant 0 : index
      %14 = vector.load %arg10[%c0_12, %c0_13] : memref<64x256xf32, #tpu.memory_space<vmem>>, vector<64x256xf32>
      %c0_14 = arith.constant 0 : index
      %c0_15 = arith.constant 0 : index
      %15 = vector.load %arg5[%c0_14, %c0_15] : memref<1x256xf32, #tpu.memory_space<vmem>>, vector<1x256xf32>
      %c0_16 = arith.constant 0 : index
      %c0_17 = arith.constant 0 : index
      %16 = vector.load %arg6[%c0_16, %c0_17] : memref<1x256xf32, #tpu.memory_space<vmem>>, vector<1x256xf32>
      %c0_18 = arith.constant 0 : index
      %c0_19 = arith.constant 0 : index
      %17 = vector.load %arg7[%c0_18, %c0_19] : memref<1x256xf32, #tpu.memory_space<vmem>>, vector<1x256xf32>
      %c0_20 = arith.constant 0 : index
      %c0_21 = arith.constant 0 : index
      %18 = vector.load %arg8[%c0_20, %c0_21] : memref<256x256xf32, #tpu.memory_space<vmem>>, vector<256x256xf32>
      %19 = vector.broadcast %15 : vector<1x256xf32> to vector<64x256xf32>
      %20 = arith.addf %14, %19 : vector<64x256xf32>
      %cst_22 = arith.constant dense<0.000000e+00> : vector<256xf32>
      %21 = vector.multi_reduction <add>, %20, %cst_22 [0] : vector<64x256xf32> to vector<256xf32>
      %22 = vector.shape_cast %21 : vector<256xf32> to vector<1x256xf32>
      %cst_23 = arith.constant dense<0.000000e+00> : vector<1x256xf32>
      %23 = tpu.matmul %22, %18, %cst_23 {dimension_numbers = #tpu.dot_dimension_numbers<[1], [0], [0], [1], [0, 0, 1, 1], [], []>} : vector<1x256xf32>, vector<256x256xf32>, vector<1x256xf32> -> vector<1x256xf32>
      %cst_24 = arith.constant 1.024000e+03 : f32
      %24 = vector.broadcast %cst_24 : f32 to vector<1x256xf32>
      %25 = arith.divf %23, %24 : vector<1x256xf32>
      %26 = vector.broadcast %25 : vector<1x256xf32> to vector<64x256xf32>
      %27 = arith.subf %20, %26 : vector<64x256xf32>
      %28 = arith.mulf %27, %27 : vector<64x256xf32>
      %cst_25 = arith.constant dense<0.000000e+00> : vector<256xf32>
      %29 = vector.multi_reduction <add>, %28, %cst_25 [0] : vector<64x256xf32> to vector<256xf32>
      %30 = vector.shape_cast %29 : vector<256xf32> to vector<1x256xf32>
      %cst_26 = arith.constant dense<0.000000e+00> : vector<1x256xf32>
      %31 = tpu.matmul %30, %18, %cst_26 {dimension_numbers = #tpu.dot_dimension_numbers<[1], [0], [0], [1], [0, 0, 1, 1], [], []>} : vector<1x256xf32>, vector<256x256xf32>, vector<1x256xf32> -> vector<1x256xf32>
      %cst_27 = arith.constant 1.023000e+03 : f32
      %32 = vector.broadcast %cst_27 : f32 to vector<1x256xf32>
      %33 = arith.divf %31, %32 : vector<1x256xf32>
      %cst_28 = arith.constant 0.000000e+00 : f32
      %34 = vector.broadcast %cst_28 : f32 to vector<1x256xf32>
      %35 = arith.maximumf %33, %34 : vector<1x256xf32>
      %36 = math.sqrt %35 : vector<1x256xf32>
      %cst_29 = arith.constant 1.000000e-10 : f32
      %37 = vector.broadcast %cst_29 : f32 to vector<1x256xf32>
      %38 = arith.addf %36, %37 : vector<1x256xf32>
      %39 = arith.divf %16, %38 : vector<1x256xf32>
      %40 = vector.broadcast %39 : vector<1x256xf32> to vector<64x256xf32>
      %41 = arith.mulf %27, %40 : vector<64x256xf32>
      %42 = vector.broadcast %17 : vector<1x256xf32> to vector<64x256xf32>
      %43 = arith.addf %41, %42 : vector<64x256xf32>
      %cst_30 = arith.constant 0.000000e+00 : f32
      %44 = vector.broadcast %cst_30 : f32 to vector<64x256xf32>
      %45 = arith.maximumf %43, %44 : vector<64x256xf32>
      %46 = arith.truncf %45 : vector<64x256xf32> to vector<64x256xbf16>
      %c0_31 = arith.constant 0 : index
      %c0_32 = arith.constant 0 : index
      %c0_33 = arith.constant 0 : index
      %47 = vector.load %arg9[%c0_31, %c0_32, %c0_33] : memref<1x64x256xbf16, #tpu.memory_space<vmem>>, vector<1x64x256xbf16>
      %48 = vector.shape_cast %47 : vector<1x64x256xbf16> to vector<64x256xbf16>
      %49 = vector.shape_cast %46 : vector<64x256xbf16> to vector<1x64x256xbf16>
      tpu.vector_store %arg9[%c0_31, %c0_32, %c0_33], %49 {strides = array<i32>} : memref<1x64x256xbf16, #tpu.memory_space<vmem>>, vector<1x64x256xbf16>,
    } else {
    }
    return
  }
  func.func @transform_0(%arg0: i32, %arg1: i32, %arg2: i32) -> (i32, i32, i32, i32) {
    %c0_i32 = arith.constant 0 : i32
    %c0_i32_0 = arith.constant 0 : i32
    %c0_i32_1 = arith.constant 0 : i32
    return %arg0, %arg2, %c0_i32, %c0_i32_0 : i32, i32, i32, i32
  }
  func.func @transform_1(%arg0: i32, %arg1: i32, %arg2: i32) -> (i32, i32, i32) {
    %c0_i32 = arith.constant 0 : i32
    %c0_i32_0 = arith.constant 0 : i32
    return %arg2, %c0_i32, %arg1 : i32, i32, i32
  }
  func.func @transform_2(%arg0: i32, %arg1: i32, %arg2: i32) -> (i32, i32) {
    %c0_i32 = arith.constant 0 : i32
    %c0_i32_0 = arith.constant 0 : i32
    return %c0_i32, %arg1 : i32, i32
  }
  func.func @transform_3(%arg0: i32, %arg1: i32, %arg2: i32) -> (i32, i32) {
    %c0_i32 = arith.constant 0 : i32
    %c0_i32_0 = arith.constant 0 : i32
    return %c0_i32, %arg1 : i32, i32
  }
  func.func @transform_4(%arg0: i32, %arg1: i32, %arg2: i32) -> (i32, i32) {
    %c0_i32 = arith.constant 0 : i32
    %c0_i32_0 = arith.constant 0 : i32
    return %c0_i32, %arg1 : i32, i32
  }
  func.func @transform_5(%arg0: i32, %arg1: i32, %arg2: i32) -> (i32, i32) {
    %c0_i32 = arith.constant 0 : i32
    return %arg1, %arg1 : i32, i32
  }
  func.func @transform_6(%arg0: i32, %arg1: i32, %arg2: i32) -> (i32, i32, i32) {
    %c0_i32 = arith.constant 0 : i32
    %c0_i32_0 = arith.constant 0 : i32
    return %arg0, %c0_i32, %arg1 : i32, i32, i32
  }
}

</mosaic_0001>

<bundles_post_ra>
// kernel: tpu_custom_call.1
= control target key start
LH: loop header
LB: loop body
LE: loop exit
PB: predicated region body
PF: predicated region fallthrough
CT: control target
= control target key end

     0   :  { %s3738_s0 = inlined_call_operand.hbm [shape: bf16[2,9,64,512], index: 0, kind: input, shape index: {}]   ;;  %s3739_s1 = inlined_call_operand.hbm [shape: bf16[9,512,512], index: 1, kind: input, shape index: {}]   ;;  %s3740_s2 = inlined_call_operand.hbm [shape: f32[1,512], index: 2, kind: input, shape index: {}]   ;;  %s3741_s3 = inlined_call_operand.hbm [shape: f32[1,512], index: 3, kind: input, shape index: {}]   ;;  %s3742_s4 = inlined_call_operand.hbm [shape: f32[1,512], index: 4, kind: input, shape index: {}]   ;;  %s3743_s5 = inlined_call_operand.hbm [shape: f32[512,512], index: 5, kind: input, shape index: {}]   ;;  %s3744_s6 = inlined_call_operand.hbm [shape: bf16[2,64,512], index: 6, kind: output, shape index: {}]  }
   0x1   :  { %3779 = sst [smem:[#allocation47_spill]] %s3738_s0 }
   0x2   :  { %3780 = sst [smem:[#allocation48_spill]] %s3739_s1 }
   0x3   :  { %3781 = sst [smem:[#allocation49_spill]] %s3740_s2 }
   0x4   :  { %3782 = sst [smem:[#allocation50_spill]] %s3741_s3 }
   0x5   :  { %3783 = sst [smem:[#allocation51_spill]] %s3742_s4 }
   0x6   :  { %3784 = sst [smem:[#allocation52_spill]] %s3743_s5 }
   0x7   :  { %3785 = sst [smem:[#allocation53_spill]] %s3744_s6 }
   0x8   :  { %11 = vsyncpa [#allocation4], 0 }
   0x9   :  { %13 = vsyncpa [#allocation4 + $0x1], 0 }
   0xa   :  { %14 = vsyncpa [#allocation7], 0 }
   0xb   :  { %16 = vsyncpa [#allocation7 + $0x1], 0 }
   0xc   :  { %17 = vsyncpa [#allocation10], 0 }
   0xd   :  { %19 = vsyncpa [#allocation10 + $0x1], 0 }
   0xe   :  { %20 = vsyncpa [#allocation13], 0 }
   0xf   :  { %22 = vsyncpa [#allocation13 + $0x1], 0 }
  0x10   :  { %23 = vsyncpa [#allocation5], 0 }
  0x11   :  { %25 = vsyncpa [#allocation5 + $0x1], 0  ;;  %s2877_s21 = smov 0   ;;  %s2879_s22 = smov 0  }
  0x12   :  { %s2881_s23 = smov 0   ;;  %s2883_s24 = smov 0  }
  0x13   :  { %s2885_s25 = smov 0   ;;  %s2887_s26 = smov 0  }
  0x14   :  { %s2889_s27 = smov 0   ;;  %s2891_s28 = smov 0  }
  0x15   :  { %s2893_s29 = smov 0   ;;  %s2895_s30 = smov 0  }
  0x16   :  { %s2897_s7 = smov 0   ;;  %s2899_s8 = smov 0  }
  0x17   :  { %s2901_s9 = smov 0   ;;  %s2903_s10 = smov 0  }
  0x18   :  { %s2905_s11 = smov 0   ;;  %s2907_s12 = smov 0  }
  0x19   :  { %s2909_s13 = smov 0   ;;  %s2911_s14 = smov 0  }
  0x1a   :  { %s2913_s15 = smov 0   ;;  %s2915_s16 = smov 0  }
  0x1b   :  { %s2917_s17 = smov 0   ;;  %s2919_s18 = smov 0  }
  0x1c LB: > { %3786 = sst [smem:[#allocation21_spill]] %s2739_s21  ;;  %s43_s19 = sadd.s32 1, %s2811_s15  ;;  %s2823_s18 = sphi %s2919_s18, %s31_s18   ;;  %s2819_s17 = sphi %s2917_s17, %s3889_s17   ;;  %s2815_s16 = sphi %s2915_s16, %s3898_s16   ;;  %s2811_s15 = sphi %s2913_s15, %s3897_s15   ;;  %s2807_s14 = sphi %s2911_s14, %s3886_s14   ;;  %s2803_s13 = sphi %s2909_s13, %s3896_s13   ;;  %s2799_s12 = sphi %s2907_s12, %s3885_s12   ;;  %s2795_s11 = sphi %s2905_s11, %s3884_s11   ;;  %s2791_s10 = sphi %s2903_s10, %s3895_s10   ;;  %s2787_s9 = sphi %s2901_s9, %s3894_s9   ;;  %s2783_s8 = sphi %s2899_s8, %s3882_s8   ;;  %s2779_s7 = sphi %s2897_s7, %s3893_s7   ;;  %s2775_s30 = sphi %s2895_s30, %s3892_s30   ;;  %s2771_s29 = sphi %s2893_s29, %s3880_s29   ;;  %s2767_s28 = sphi %s2891_s28, %s3879_s28   ;;  %s2763_s27 = sphi %s2889_s27, %s3878_s27   ;;  %s2759_s26 = sphi %s2887_s26, %s3890_s26   ;;  %s2755_s25 = sphi %s2885_s25, %s3877_s25   ;;  %s2751_s24 = sphi %s2883_s24, %s3876_s24   ;;  %s2747_s23 = sphi %s2881_s23, %s3875_s23   ;;  %s2743_s22 = sphi %s2879_s22, %s3874_s22   ;;  %s2739_s21 = sphi %s2877_s21, %s3873_s21  }
  0x1d   : > { %3787 = sst [smem:[#allocation22_spill]] %s2743_s22  ;;  %s46_s20 = sadd.s32 1, %s2815_s16 }
  0x1e   : > { %3788 = sst [smem:[#allocation23_spill]] %s2747_s23  ;;  %p44_p0 = scmp.ge.s32.totalorder %s43_s19, 9 }
  0x1f   : > { %3789 = sst [smem:[#allocation24_spill]] %s2751_s24  ;;  %p3763_p1 = scmp.eq.s32.totalorder %s2823_s18, 0 }
  0x20   : > { %3790 = sst [smem:[#allocation25_spill]] %s2755_s25  ;;  %s87_s6 = sadd.s32 1, %s2783_s8 }
  0x21   : > { %3791 = sst [smem:[#allocation26_spill]] %s2759_s26  ;;  %p94_p2 = scmp.ne.s32.totalorder %s2783_s8, %s2779_s7 }
  0x22   : > { %3792 = sst [smem:[#allocation27_spill]] %s2767_s28  ;;  %s3900_s19 = smov (%p44_p0, %s43_s19), 0 }
  0x23   : > { %3793 = sst [smem:[#allocation28_spill]] %s2771_s29  ;;  %s3902_s20 = smov (!%p44_p0, %s46_s20), %s2815_s16 }
  0x24   : > { %3794 = sst [smem:[#allocation29_spill]] %s2783_s8  ;;  %p3004_p3 = por %p94_p2, %p3763_p1 }
  0x25   : > { %3795 = sst [smem:[#allocation30_spill]] %s2787_s9  ;;  %p48_p4 = scmp.ge.s32.totalorder %s3902_s20, 2 }
  0x26   : > { %3796 = sst [smem:[#allocation31_spill]] %s2795_s11  ;;  %p100_p5 = scmp.ne.s32.totalorder %s2779_s7, %s2775_s30 }
  0x27   : > { %3797 = sst [smem:[#allocation32_spill]] %s2799_s12  ;;  %p3759_p6 = scmp.lt.s32.totalorder %s2823_s18, 36 }
  0x28   : > { %3798 = sst [smem:[#allocation33_spill]] %s2803_s13  ;;  %s283_s25 = sand.u32 1, %s2783_s8  }
  0x29   : > { %3799 = sst [smem:[#allocation34_spill]] %s2807_s14  ;;  %s3000_s14 = ssub.s32 %s2811_s15, %s3900_s19 }
  0x2a   : > { %3800 = sst [smem:[#allocation35_spill]] %s2811_s15  ;;  %s1945_s26 = sshll.u32 %s283_s25, 9 }
  0x2b   : > { %3801 = sst [smem:[#allocation36_spill]] %s2819_s17  ;;  %s3755_s4 = sshll.u32 %s2815_s16, 1 }
  0x2c   : > { %3802 = sst [smem:[#allocation37_spill]] %s3900_s19  ;;  %s1947_s0 = sshll.u32 %s2811_s15, 8 }
  0x2d   : > { %3803 = sst [smem:[#allocation38_spill]] %s3000_s14  ;;  %s285_s21 = scalar_lea.vmem [#allocation6], %s1945_s26 }
  0x2e   : > { %s3015_s12 = scalar_select %p48_p4, 0, %s3902_s20  }
  0x2f   : > { %s294_s22 = sshll.u32 %s285_s21, 4  ;;  %s291_s23 = sadd.s32 %s1947_s0, %s3755_s4  ;;  %s295_s22 = int_to_ptr.vmem [resolvable:$true] %s294_s22 }
  0x30   : > { %3805 = sst [smem:[#allocation39_spill]] %s3015_s12  ;;  %s3020_s19 = ssub.s32 %s2815_s16, %s3015_s12 }
  0x31   : > { %s84_s24 = sor.u32 %s3020_s19, %s3000_s14  ;;  %s1948_s9 = sshll.u32 %s291_s23, 6 }
  0x32   : > { %p85_p7 = scmp.eq.s32.totalorder %s84_s24, 0  ;;  %p3036_p8 = pnand %p3759_p6, %p3004_p3 }
  0x33   : > { %s3808_s1 = sld [smem:[#allocation48_spill]]  ;;  %s2444_s21 = scalar_lea.vmem %s295_s22, 8192 }
  0x34   : > { %s3027_s2 = scalar_select %p85_p7, %s2783_s8, %s87_s6  }
  0x35   : > { %s3809_s6 = sand.u32 1, %s2823_s18   ;;  %p2433_p9 = pneg %p3036_p8 }
  0x36   : > { %3806 = sst [smem:[#allocation40_spill]] %s3027_s2  ;;  %s3045_s25 = scalar_lea.sflag [#allocation7], %s3809_s6 }
  0x37   : > { %p2445_p10 = scmp.ne.s32.totalorder %s295_s22, %s2444_s21  ;;  %s2825_s0 = smov [#allocation6]  }
  0x38   : > { %s2449_s23 = sshll.u32 %s2825_s0, 4  ;;  %s2450_s23 = int_to_ptr.vmem [resolvable:$false] %s2449_s23 }
  0x39   : > { %s293_s24 = scalar_lea.hbm %s3808_s1, %s1948_s9  ;;  %p2447_p11 = pnand %p2445_p10, %p2433_p9 }
  0x3a   : > { %s2451_s26 = scalar_lea.vmem %s2450_s23, 16384  ;;  %p2452_p13 = scmp.lt.s32.totalorder %s295_s22, %s2450_s23 }
  0x3b   : > { %p2448_p12 = pneg %p2447_p11  ;;  %p2453_p0 = scmp.lt.s32.totalorder %s2451_s26, %s2444_s21 }
  0x3d   : > { %p2454_p2 = por %p2453_p0, %p2452_p13 }
  0x3f   : > { %p2455_p3 = pnand %p2454_p2, %p2448_p12 }
  0x41   : > { %2458 = shalt.err (!%p2455_p3)
}
  0x42   : > { %s3756_s12 = smov 256   ;;  %s2827_s9 = smov 128  }
  0x43   : > { %s2828_s13 = smov 8   ;;  %p1963_p7 = scmp.ge.s32.totalorder %s2823_s18, 1 }
  0x44   : > { %2100 = dma.hbm_to_vmem [thread:$0]  (!%p3036_p8), %s293_s24, 8192, %s295_s22, %s3045_s25, %s3756_s12, %s2827_s9, %s2828_s13  }
  0x45   : > { %p383_p9 = scmp.lt.s32.totalorder %s2823_s18, 37  ;;  %s3060_s6 = sadd.s32 4294967295, %s2823_s18  }
  0x46   : > { %p3760_p11 = scmp.eq.s32.totalorder %s3060_s6, 0  ;;  %p111_p12 = scmp.eq.s32.totalorder %s3020_s19, 0 }
  0x47   : > { %p3055_p10 = pnand %p1963_p7, %p383_p9  ;;  %s113_s5 = sadd.s32 1, %s2771_s29 }
  0x48   : > { %p120_p13 = scmp.ne.s32.totalorder %s2771_s29, %s2767_s28  ;;  %p3072_p8 = por %p100_p5, %p3760_p11 }
  0x49   : > { %p126_p0 = scmp.ne.s32.totalorder %s2767_s28, %s2763_s27  ;;  %s306_s0 = sand.u32 1, %s2771_s29  }
  0x4a   : > { %s3811_s22 = scalar_select %p3072_p8, 1, 0 }
  0x4b   : > { %s3079_s24 = scalar_select %p111_p12, %s2771_s29, %s113_s5  }
  0x4c   : > { %3812 = sst [smem:[#allocation41_spill]] %s3811_s22  ;;  %p122_p2 = por %p120_p13, %p3763_p1 }
  0x4d   : > { %3813 = sst [smem:[#allocation42_spill]] %s3079_s24  ;;  %p3085_p3 = por %p126_p0, %p3760_p11 }
  0x4e   : > { %s3091_s23 = sshll.u32 %s306_s0, 1  ;;  %s3094_s30 = sshll.u32 %s2815_s16, 5 }
  0x4f   : > { %s3814_s21 = scalar_select %p3085_p3, 1, 0 }
  0x50   : > { %p3098_p5 = pnand %p3759_p6, %p122_p2  ;;  %s3817_s3 = sld [smem:[#allocation50_spill]] }
  0x51   : > { %3815 = sst [smem:[#allocation43_spill]] %s3814_s21  ;;  %s327_s5 = scalar_lea.vmem [#allocation9], %s3091_s23 }
  0x52   : > { %s335_s4 = sshll.u32 %s327_s5, 4  ;;  %s3818_s0 = sand.u32 1, %s2823_s18   ;;  %s336_s4 = int_to_ptr.vmem [resolvable:$true] %s335_s4 }
  0x53   : > { %s3109_s12 = scalar_lea.sflag [#allocation10], %s3818_s0  ;;  %p3762_p9 = pneg %p3098_p5 }
  0x54   : > { %s2472_s1 = scalar_lea.vmem %s336_s4, 32  ;;  %s2829_s2 = smov [#allocation9]  }
  0x55   : > { %p2473_p12 = scmp.ne.s32.totalorder %s336_s4, %s2472_s1  ;;  %s2477_s8 = sshll.u32 %s2829_s2, 4  ;;  %s2478_s8 = int_to_ptr.vmem [resolvable:$false] %s2477_s8 }
  0x56   : > { %s333_s13 = scalar_lea.hbm %s3817_s3, %s3094_s30  ;;  %s2479_s26 = scalar_lea.vmem %s2478_s8, 64 }
  0x57   : > { %p2475_p13 = pnand %p2473_p12, %p3762_p9  ;;  %p2480_p2 = scmp.lt.s32.totalorder %s336_s4, %s2478_s8 }
  0x58   : > { %p2481_p6 = scmp.lt.s32.totalorder %s2479_s26, %s2472_s1 }
  0x59   : > { %p2476_p0 = pneg %p2475_p13 }
  0x5a   : > { %p2482_p7 = por %p2481_p6, %p2480_p2 }
  0x5c   : > { %p2483_p11 = pnand %p2482_p7, %p2476_p0 }
  0x5e   : > { %2486 = shalt.err (!%p2483_p11)
}
  0x5f   : > { %s3819_s9 = sld [smem:[#allocation30_spill]]  ;;  %s1939_s0 = sadd.s32 4294967294, %s2823_s18  }
  0x60   : > { %s3820_s2 = sld [smem:[#allocation23_spill]]  ;;  %s50_s26 = sadd.s32 1, %s2819_s17 }
  0x61   : > { %s3821_s8 = sld [smem:[#allocation22_spill]]  ;;  %s59_s3 = sadd.s32 1, %s2795_s11 }
  0x62   : > { %s3822_s1 = sld [smem:[#allocation21_spill]]  ;;  %s3904_s26 = smov (!%p48_p4, %s50_s26), %s2819_s17 }
  0x63   : > { %2106 = dma.hbm_to_vmem [thread:$0]  (!%p3098_p5), %s333_s13, 32, %s336_s4, %s3109_s12  }
  0x64   : > { %s3823_s5 = sld [smem:[#allocation38_spill]]  ;;  %p66_p6 = scmp.ne.s32.totalorder %s2795_s11, %s2791_s10 }
  0x65   : > { %p72_p11 = scmp.ne.s32.totalorder %s2791_s10, %s3819_s9  ;;  %p52_p7 = scmp.ge.s32.totalorder %s3904_s26, 2 }
  0x66   : > { %s221_s24 = sadd.s32 1, %s3820_s2  ;;  %p3132_p12 = por %p3763_p1, %p66_p6 }
  0x67   : > { %p3825_p13 = scmp.eq.s32.totalorder %s3060_s6, 0  ;;  %s3906_s26 = smov (%p52_p7, %s3904_s26), 0 }
  0x68   : > { %3827 = sst [smem:[#allocation44_spill]] %s3906_s26  ;;  %p231_p4 = scmp.ne.s32.totalorder %s3820_s2, %s3821_s8 }
  0x69   : > { %p3138_p0 = por %p3825_p13, %p72_p11  ;;  %p237_p2 = scmp.ne.s32.totalorder %s3821_s8, %s3822_s1 }
  0x6a   : > { %s54_s20 = ssub.s32 %s2819_s17, %s3906_s26  ;;  %p238_p9 = scmp.eq.s32.totalorder %s1939_s0, 35 }
  0x6b   : > { %s56_s13 = sor.u32 %s3823_s5, %s54_s20  ;;  %s218_s9 = sor.u32 %s3020_s19, %s54_s20 }
  0x6c   : > { %p57_p6 = scmp.eq.s32.totalorder %s56_s13, 0  ;;  %p219_p1 = scmp.eq.s32.totalorder %s218_s9, 0 }
  0x6d   : > { %p3828_p3 = scmp.eq.s32.totalorder %s3060_s6, 35  ;;  %p3158_p11 = por %p238_p9, %p237_p2 }
  0x6e   : > { %s3163_s22 = scalar_select %p57_p6, %s2795_s11, %s59_s3  }
  0x6f   : > { %p3154_p8 = por %p3828_p3, %p231_p4  ;;  %s3908_s2 = smov (!%p219_p1, %s3820_s2), %s221_s24 }
  0x70   : > { %s3831_s28 = scalar_select %p3158_p11, 1, 0 }
  0x71   : > { %s3829_s21 = scalar_select %p3154_p8, 1, 0 }
  0x72   : > { %3832 = sst [smem:[#allocation38_spill]] %s3831_s28  ;;  %s258_s8 = sand.u32 1, %s2795_s11  }
  0x73   : > { %3830 = sst [smem:[#allocation30_spill]] %s3829_s21  ;;  %s1943_s1 = sshll.u32 %s2811_s15, 5 }
  0x74   : > { %3833 = sst [smem:[#allocation45_spill]] %s3163_s22  ;;  %s1942_s0 = sshll.u32 %s258_s8, 7 }
  0x75   : > { %3834 = sst [smem:[#allocation46_spill]] %s3908_s2  ;;  %s2079_s5 = smul.u32 288, %s2819_s17 }
  0x76   : > { %s262_s20 = scalar_lea.vmem [#allocation3], %s1942_s0  ;;  %p3835_p7 = scmp.lt.s32.totalorder %s2823_s18, 36 }
  0x77   : > { %s271_s13 = sshll.u32 %s262_s20, 4  ;;  %s268_s26 = sadd.s32 %s2079_s5, %s1943_s1  ;;  %s272_s13 = int_to_ptr.vmem [resolvable:$true] %s271_s13 }
  0x78   : > { %p3175_p3 = pnand %p3835_p7, %p3132_p12  ;;  %s1944_s28 = sshll.u32 %s268_s26, 6 }
  0x79   : > { %s3837_s24 = sld [smem:[#allocation47_spill]]  ;;  %s259_s11 = scalar_lea.sflag [#allocation4], %s258_s8 }
  0x7a   : > { %p2489_p1 = pneg %p3175_p3  ;;  %s2500_s17 = scalar_lea.vmem %s272_s13, 2048 }
  0x7b   : > { %p2501_p9 = scmp.ne.s32.totalorder %s272_s13, %s2500_s17  ;;  %s2830_s29 = smov [#allocation3]  }
  0x7c   : > { %s2505_s0 = sshll.u32 %s2830_s29, 4  ;;  %s2506_s0 = int_to_ptr.vmem [resolvable:$false] %s2505_s0 }
  0x7d   : > { %p2503_p13 = pnand %p2501_p9, %p2489_p1  ;;  %s2507_s20 = scalar_lea.vmem %s2506_s0, 4096 }
  0x7e   : > { %p2508_p12 = scmp.lt.s32.totalorder %s272_s13, %s2506_s0  ;;  %p2509_p2 = scmp.lt.s32.totalorder %s2507_s20, %s2500_s17 }
  0x7f   : > { %s270_s2 = scalar_lea.hbm %s3837_s24, %s1944_s28  ;;  %p2504_p4 = pneg %p2503_p13 }
  0x80   : > { %p2510_p6 = por %p2509_p2, %p2508_p12 }
  0x82   : > { %p2511_p7 = pnand %p2510_p6, %p2504_p4 }
  0x84   : > { %2514 = shalt.err (!%p2511_p7)
}
  0x85   : > { %s2831_s26 = smov 16   ;;  %s3838_s28 = smov 256  }
  0x86   : > { %2097 = dma.hbm_to_vmem [thread:$0]  (!%p3175_p3), %s270_s2, 2048, %s272_s13, %s259_s11, %s3838_s28, %s3838_s28, %s2831_s26  }
  0x87   : > { %s3839_s1 = sld [smem:[#allocation49_spill]]  ;;  %s308_s3 = scalar_lea.vmem [#allocation8], %s3091_s23 }
  0x88   : > { %s316_s17 = sshll.u32 %s308_s3, 4  ;;  %s3840_s0 = sld [smem:[#allocation51_spill]]  ;;  %s317_s17 = int_to_ptr.vmem [resolvable:$true] %s316_s17 }
  0x89   : > { %s2528_s9 = scalar_lea.vmem %s317_s17, 32  ;;  %p3841_p9 = pneg %p3098_p5 }
  0x8a   : > { %p2529_p1 = scmp.ne.s32.totalorder %s317_s17, %s2528_s9  ;;  %s2832_s15 = smov [#allocation8]  }
  0x8b   : > { %s2533_s21 = sshll.u32 %s2832_s15, 4  ;;  %s2534_s21 = int_to_ptr.vmem [resolvable:$false] %s2533_s21 }
  0x8c   : > { %p2531_p13 = pnand %p2529_p1, %p3841_p9  ;;  %s2535_s11 = scalar_lea.vmem %s2534_s21, 64 }
  0x8d   : > { %s314_s5 = scalar_lea.hbm %s3839_s1, %s3094_s30  ;;  %p2536_p3 = scmp.lt.s32.totalorder %s317_s17, %s2534_s21 }
  0x8e   : > { %s352_s20 = scalar_lea.hbm %s3840_s0, %s3094_s30  ;;  %p2532_p4 = pneg %p2531_p13 }
  0x8f   : > { %p2537_p12 = scmp.lt.s32.totalorder %s2535_s11, %s2528_s9 }
  0x91   : > { %p2538_p2 = por %p2537_p12, %p2536_p3 }
  0x93   : > { %p2539_p6 = pnand %p2538_p2, %p2532_p4 }
  0x95   : > { %2542 = shalt.err (!%p2539_p6)
}
  0x96   : > { %2103 = dma.hbm_to_vmem [thread:$0]  (!%p3098_p5), %s314_s5, 32, %s317_s17, %s3045_s25  }
  0x97   : > { %s346_s2 = scalar_lea.vmem [#allocation11], %s3091_s23  ;;  %p3842_p1 = pmov %p3841_p9 }
  0x98   : > { %s354_s13 = sshll.u32 %s346_s2, 4  ;;  %s2833_s15 = smov [#allocation11]   ;;  %s355_s13 = int_to_ptr.vmem [resolvable:$true] %s354_s13 }
  0x99   : > { %s2556_s22 = scalar_lea.vmem %s355_s13, 32  ;;  %s2561_s21 = sshll.u32 %s2833_s15, 4  ;;  %s2562_s21 = int_to_ptr.vmem [resolvable:$false] %s2561_s21 }
  0x9a   : > { %p2557_p7 = scmp.ne.s32.totalorder %s355_s13, %s2556_s22  ;;  %s2563_s8 = scalar_lea.vmem %s2562_s21, 64 }
  0x9b   : > { %p2564_p4 = scmp.lt.s32.totalorder %s355_s13, %s2562_s21  ;;  %p2565_p3 = scmp.lt.s32.totalorder %s2563_s8, %s2556_s22 }
  0x9c   : > { %p2559_p9 = pnand %p2557_p7, %p3842_p1 }
  0x9d   : > { %p2566_p12 = por %p2565_p3, %p2564_p4 }
  0x9e   : > { %p2560_p13 = pneg %p2559_p9 }
  0xa0   : > { %p2567_p2 = pnand %p2566_p12, %p2560_p13 }
  0xa2   : > { %2570 = shalt.err (!%p2567_p2)
}
  0xa3   : > { %s3843_s1 = sld [smem:[#allocation26_spill]]  ;;  %s190_s27 = sor.u32 %s3020_s19, %s3020_s19 }
  0xa4   : > { %s3844_s5 = sld [smem:[#allocation25_spill]]  ;;  %p191_p6 = scmp.eq.s32.totalorder %s190_s27, 0 }
  0xa5   : > { %s3845_s3 = sld [smem:[#allocation24_spill]]  ;;  %p3846_p9 = scmp.eq.s32.totalorder %s2823_s18, 0 }
  0xa6   : > { %2109 = dma.hbm_to_vmem [thread:$0]  (!%p3098_p5), %s352_s20, 32, %s355_s13, %s3109_s12  }
  0xa7   : > { %p3847_p4 = scmp.eq.s32.totalorder %s3060_s6, 0  ;;  %s2070_s9 = sshll.u32 %s2815_s16, 7 }
  0xa8   : > { %s3849_s12 = sshll.u32 %s2815_s16, 1  ;;  %s3850_s15 = sld [smem:[#allocation52_spill]] }
  0xa9   : > { %s193_s17 = sadd.s32 1, %s3843_s1  ;;  %s361_s30 = sand.u32 1, %s3843_s1  }
  0xaa   : > { %p200_p7 = scmp.ne.s32.totalorder %s3843_s1, %s3844_s5  ;;  %s3910_s1 = smov (!%p191_p6, %s3843_s1), %s193_s17 }
  0xab   : > { %p206_p1 = scmp.ne.s32.totalorder %s3844_s5, %s3845_s3  ;;  %s1958_s29 = sshll.u32 %s361_s30, 9 }
  0xac   : > { %p202_p13 = por %p200_p7, %p3846_p9  ;;  %s372_s20 = sadd.s32 %s2070_s9, %s3849_s12 }
  0xad   : > { %p3231_p3 = por %p206_p1, %p3847_p4  ;;  %s365_s19 = scalar_lea.vmem [#allocation12], %s1958_s29 }
  0xae   : > { %s375_s11 = sshll.u32 %s365_s19, 4  ;;  %s1962_s2 = sshll.u32 %s372_s20, 7  ;;  %s376_s11 = int_to_ptr.vmem [resolvable:$true] %s375_s11 }
  0xaf   : > { %s374_s21 = scalar_lea.hbm %s3850_s15, %s1962_s2  ;;  %p3851_p5 = scmp.lt.s32.totalorder %s2823_s18, 36 }
  0xb0   : > { %s362_s25 = scalar_lea.sflag [#allocation13], %s361_s30  ;;  %s2584_s23 = scalar_lea.vmem %s376_s11, 8192 }
  0xb1   : > { %p3243_p12 = pnand %p3851_p5, %p202_p13  ;;  %p2585_p6 = scmp.ne.s32.totalorder %s376_s11, %s2584_s23 }
  0xb2   : > { %s2834_s5 = smov [#allocation12]  }
  0xb3   : > { %p2573_p2 = pneg %p3243_p12  ;;  %s2589_s3 = sshll.u32 %s2834_s5, 4  ;;  %s2590_s3 = int_to_ptr.vmem [resolvable:$false] %s2589_s3 }
  0xb4   : > { %s2591_s27 = scalar_lea.vmem %s2590_s3, 16384  ;;  %p2592_p9 = scmp.lt.s32.totalorder %s376_s11, %s2590_s3 }
  0xb5   : > { %p2587_p7 = pnand %p2585_p6, %p2573_p2  ;;  %p2593_p4 = scmp.lt.s32.totalorder %s2591_s27, %s2584_s23 }
  0xb7   : > { %p2588_p1 = pneg %p2587_p7  ;;  %p2594_p11 = por %p2593_p4, %p2592_p9 }
  0xb9   : > { %p2595_p8 = pnand %p2594_p11, %p2588_p1 }
  0xbb   : > { %2598 = shalt.err (!%p2595_p8)
}
  0xbc   : > { %s2835_s17 = smov 512   ;;  %387 = sbr.rel (%p3055_p10) target bundleno = 1128 (0x468), region = 44 }
  0xbd   : > { %2112 = dma.hbm_to_vmem [thread:$0]  (!%p3243_p12), %s374_s21, 8192, %s376_s11, %s362_s25, %s2835_s17, %s3838_s28, %s2831_s26  }
  0xbe   : > { %s389_s30 = sand.u32 (!%p3055_p10), 1, %s2791_s10  }
  0xbf   : > { %s1964_s29 = sshll.u32 (!%p3055_p10), %s389_s30, 7  ;;  %s390_s9 = scalar_lea.sflag (!%p3055_p10), [#allocation4], %s389_s30 }
  0xc0   : > { %s3256_s12 = scalar_lea.vmem (!%p3055_p10), [#allocation3], %s1964_s29 }
  0xc1   : > { %2714 = dma.done.wait (%p3138_p0), %s390_s9, 2048  }
  0xc2   : > { %2716 = vsyncadd (%p3138_p0), %s390_s9, 4294965248  ;;  %s3853_s20 = sld [smem:[#allocation41_spill]]  ;;  %s398_s19 = sand.u32 1, %s3060_s6  }
  0xc3   : > { %s400_s26 = sand.u32 1, %s2779_s7   ;;  %s399_s14 = scalar_lea.sflag [#allocation7], %s398_s19 }
  0xc4   : > { %s1965_s28 = sshll.u32 %s400_s26, 9 }
  0xc5   : > { %s3264_s11 = scalar_lea.vmem [#allocation6], %s1965_s28 }
  0xc8   : > { %p3854_p10 = scmp.ne.s32.totalorder %s3853_s20, 0 }
  0xca   : > { %2718 = dma.done.wait (%p3854_p10), %s399_s14, 8192  }
  0xcb   : > { %2720 = vsyncadd (%p3854_p10), %s399_s14, 4294959104  ;;  %s3855_s2 = sld [smem:[#allocation27_spill]] }
  0xcc   : > { %s3856_s13 = sld [smem:[#allocation43_spill]] }
  0xd1   : > { %s409_s22 = sand.u32 1, %s3855_s2  }
  0xd2   : > { %s3271_s15 = sshll.u32 %s409_s22, 1  ;;  %p3857_p8 = scmp.ne.s32.totalorder %s3856_s13, 0 }
  0xd3   : > { %s411_s4 = scalar_lea.vmem [#allocation8], %s3271_s15 }
  0xd4   : > { %2722 = dma.done.wait (%p3857_p8), %s399_s14, 32  }
  0xd5   : > { %2724 = vsyncadd (%p3857_p8), %s399_s14, 4294967264  ;;  %s417_s6 = scalar_lea.sflag [#allocation10], %s398_s19  ;;  %s420_s21 = scalar_lea.vmem [#allocation9], %s3271_s15 }
  0xd6   : > { %2726 = dma.done.wait (%p3857_p8), %s417_s6, 64  }
  0xd7   : > { %2728 = vsyncadd (%p3857_p8), %s417_s6, 4294967232  ;;  %s3858_s8 = sld [smem:[#allocation25_spill]]  ;;  %s429_s5 = scalar_lea.vmem [#allocation11], %s3271_s15 }
  0xdd   : > { %s434_s25 = sand.u32 1, %s3858_s8  }
  0xde   : > { %s1969_s23 = sshll.u32 %s434_s25, 9  ;;  %s435_s3 = scalar_lea.sflag [#allocation13], %s434_s25 }
  0xdf   : > { %s3285_s27 = scalar_lea.vmem [#allocation12], %s1969_s23 }
  0xe0   : > { %2730 = dma.done.wait (%p3231_p3), %s435_s3, 8192  }
  0xe1   : > { %2732 = vsyncadd (%p3231_p3), %s435_s3, 4294959104  ;;  %s3859_s17 = sld [smem:[#allocation22_spill]] }
  0xe2   : > { %s3860_s20 = sld [smem:[#allocation32_spill]] }
  0xe7   : > { %s489_s30 = sand.u32 1, %s3859_s17  }
  0xe8   : > { %s1970_s29 = sshll.u32 %s489_s30, 6  ;;  %p1971_p0 = scmp.ne.s32.totalorder %s3860_s20, 0 }
  0xe9   : > { %s3294_s9 = scalar_lea.vmem [#allocation14], %s1970_s29 }
  0xea   : > { %502 = sbr.rel (%p1971_p0) target bundleno = 248 (0xf8), region = 72 }
  0xef   : > { %v2836_v0 = vmov 0.0  }
  0xf0   : > { %503 = vst [vmem:[#allocation2 + $0x30] sm:$0xff] %v2836_v0  ;;  %504 = vst [vmem:[#allocation2] sm:$0xff] %v2836_v0 }
  0xf1   : > { %505 = vst [vmem:[#allocation2 + $0x58] sm:$0xff] %v2836_v0  ;;  %506 = vst [vmem:[#allocation2 + $0x18] sm:$0xff] %v2836_v0 }
  0xf2   : > { %507 = vst [vmem:[#allocation2 + $0x50] sm:$0xff] %v2836_v0  ;;  %508 = vst [vmem:[#allocation2 + $0x68] sm:$0xff] %v2836_v0 }
  0xf3   : > { %509 = vst [vmem:[#allocation2 + $0x8] sm:$0xff] %v2836_v0  ;;  %510 = vst [vmem:[#allocation2 + $0x48] sm:$0xff] %v2836_v0 }
  0xf4   : > { %511 = vst [vmem:[#allocation2 + $0x40] sm:$0xff] %v2836_v0  ;;  %512 = vst [vmem:[#allocation2 + $0x20] sm:$0xff] %v2836_v0 }
  0xf5   : > { %513 = vst [vmem:[#allocation2 + $0x10] sm:$0xff] %v2836_v0  ;;  %514 = vst [vmem:[#allocation2 + $0x38] sm:$0xff] %v2836_v0 }
  0xf6   : > { %515 = vst [vmem:[#allocation2 + $0x60] sm:$0xff] %v2836_v0  ;;  %516 = vst [vmem:[#allocation2 + $0x70] sm:$0xff] %v2836_v0 }
  0xf7   : > { %517 = vst [vmem:[#allocation2 + $0x78] sm:$0xff] %v2836_v0  ;;  %518 = vst [vmem:[#allocation2 + $0x28] sm:$0xff] %v2836_v0 }
  0xf8 PF: > { %v2305_v1 = vld [vmem:[%s3264_s11 + $0x74] ss:$8 sps:$4 sm:$0xff]   ;;  %v2309_v3 = vld [vmem:[%s3264_s11 + $0x70] ss:$8 sps:$4 sm:$0xff]   ;;  %v2311_v5 = vld [vmem:[%s3264_s11 + $0x64] ss:$8 sps:$4 sm:$0xff]  }
  0xf9   : > { %v2307_v2 = vld [vmem:[%s3264_s11 + $0x174] ss:$8 sps:$4 sm:$0xff]   ;;  %1015 = vmatprep.subr.bf16.mxu0 %v2305_v1  ;;  %v2310_v4 = vld [vmem:[%s3264_s11 + $0x170] ss:$8 sps:$4 sm:$0xff]   ;;  %v2313_v6 = vld [vmem:[%s3264_s11 + $0x164] ss:$8 sps:$4 sm:$0xff]  }
  0xfa   : > { %1088 = vmatprep.subr.bf16.mxu1 %v2307_v2  ;;  %1016 = vmatpush1.bf16.msra.mxu0 %v2309_v3  ;;  %v2315_v7 = vld [vmem:[%s3264_s11 + $0x60] ss:$8 sps:$4 sm:$0xff]   ;;  %v2317_v9 = vld [vmem:[%s3264_s11 + $0x54] ss:$8 sps:$4 sm:$0xff]   ;;  %v2321_v11 = vld [vmem:[%s3264_s11 + $0x50] ss:$8 sps:$4 sm:$0xff]  }
  0xfb   : > { %1089 = vmatpush1.bf16.msra.mxu1 %v2310_v4  ;;  %1017 = vmatprep.subr.bf16.mxu0 %v2311_v5  ;;  %v2316_v8 = vld [vmem:[%s3264_s11 + $0x160] ss:$8 sps:$4 sm:$0xff]   ;;  %v2319_v10 = vld [vmem:[%s3264_s11 + $0x154] ss:$8 sps:$4 sm:$0xff]   ;;  %v2322_v12 = vld [vmem:[%s3264_s11 + $0x150] ss:$8 sps:$4 sm:$0xff]  }
  0xfc   : > { %1090 = vmatprep.subr.bf16.mxu1 %v2313_v6  ;;  %v2323_v13 = vld [vmem:[%s3264_s11 + $0x44] ss:$8 sps:$4 sm:$0xff]   ;;  %v2327_v15 = vld [vmem:[%s3264_s11 + $0x40] ss:$8 sps:$4 sm:$0xff]   ;;  %v2329_v17 = vld [vmem:[%s3264_s11 + $0x34] ss:$8 sps:$4 sm:$0xff]  }
  0xfd   : > { %v2325_v14 = vld [vmem:[%s3264_s11 + $0x144] ss:$8 sps:$4 sm:$0xff]   ;;  %v2328_v16 = vld [vmem:[%s3264_s11 + $0x140] ss:$8 sps:$4 sm:$0xff]   ;;  %v2331_v18 = vld [vmem:[%s3264_s11 + $0x134] ss:$8 sps:$4 sm:$0xff]  }
  0xfe   : > { %1018 = vmatpush1.bf16.msra.mxu0 %v2315_v7  ;;  %v2333_v19 = vld [vmem:[%s3264_s11 + $0x30] ss:$8 sps:$4 sm:$0xff]   ;;  %v2335_v21 = vld [vmem:[%s3264_s11 + $0x24] ss:$8 sps:$4 sm:$0xff]   ;;  %v2339_v23 = vld [vmem:[%s3264_s11 + $0x20] ss:$8 sps:$4 sm:$0xff]  }
  0xff   : > { %1091 = vmatpush1.bf16.msra.mxu1 %v2316_v8  ;;  %1019 = vmatprep.subr.bf16.mxu0 %v2317_v9  ;;  %v2334_v20 = vld [vmem:[%s3264_s11 + $0x130] ss:$8 sps:$4 sm:$0xff]   ;;  %v2337_v22 = vld [vmem:[%s3264_s11 + $0x124] ss:$8 sps:$4 sm:$0xff]   ;;  %v2340_v24 = vld [vmem:[%s3264_s11 + $0x120] ss:$8 sps:$4 sm:$0xff]  }
 0x100   : > { %1092 = vmatprep.subr.bf16.mxu1 %v2319_v10  ;;  %v2341_v25 = vld [vmem:[%s3264_s11 + $0x14] ss:$8 sps:$4 sm:$0xff]   ;;  %v2345_v27 = vld [vmem:[%s3264_s11 + $0x10] ss:$8 sps:$4 sm:$0xff]   ;;  %v2347_v29 = vld [vmem:[%s3264_s11 + $0x4] ss:$8 sps:$4 sm:$0xff]  }
 0x101   : > { %v2343_v26 = vld [vmem:[%s3264_s11 + $0x114] ss:$8 sps:$4 sm:$0xff]   ;;  %v2346_v28 = vld [vmem:[%s3264_s11 + $0x110] ss:$8 sps:$4 sm:$0xff]   ;;  %v2349_v30 = vld [vmem:[%s3264_s11 + $0x104] ss:$8 sps:$4 sm:$0xff]  }
 0x102   : > { %1020 = vmatpush1.bf16.msra.mxu0 %v2321_v11  ;;  %v2351_v31 = vld [vmem:[%s3264_s11] ss:$8 sps:$4 sm:$0xff]   ;;  %v2353_v33 = vld [vmem:[%s3264_s11 + $0xf4] ss:$8 sps:$4 sm:$0xff]   ;;  %v2357_v35 = vld [vmem:[%s3264_s11 + $0xf0] ss:$8 sps:$4 sm:$0xff]  }
 0x103   : > { %1093 = vmatpush1.bf16.msra.mxu1 %v2322_v12  ;;  %1021 = vmatprep.subr.bf16.mxu0 %v2323_v13  ;;  %v2352_v32 = vld [vmem:[%s3264_s11 + $0x100] ss:$8 sps:$4 sm:$0xff]   ;;  %v2355_v34 = vld [vmem:[%s3264_s11 + $0x1f4] ss:$8 sps:$4 sm:$0xff]   ;;  %v2358_v36 = vld [vmem:[%s3264_s11 + $0x1f0] ss:$8 sps:$4 sm:$0xff]  }
 0x104   : > { %1094 = vmatprep.subr.bf16.mxu1 %v2325_v14  ;;  %v2359_v37 = vld [vmem:[%s3264_s11 + $0xe4] ss:$8 sps:$4 sm:$0xff]   ;;  %v2363_v39 = vld [vmem:[%s3264_s11 + $0xe0] ss:$8 sps:$4 sm:$0xff]   ;;  %v2365_v41 = vld [vmem:[%s3264_s11 + $0xd4] ss:$8 sps:$4 sm:$0xff]  }
 0x105   : > { %v2361_v38 = vld [vmem:[%s3264_s11 + $0x1e4] ss:$8 sps:$4 sm:$0xff]   ;;  %v2364_v40 = vld [vmem:[%s3264_s11 + $0x1e0] ss:$8 sps:$4 sm:$0xff]   ;;  %v2367_v42 = vld [vmem:[%s3264_s11 + $0x1d4] ss:$8 sps:$4 sm:$0xff]  }
 0x106   : > { %1022 = vmatpush1.bf16.msra.mxu0 %v2327_v15  ;;  %v2369_v43 = vld [vmem:[%s3264_s11 + $0xd0] ss:$8 sps:$4 sm:$0xff]   ;;  %v2371_v45 = vld [vmem:[%s3264_s11 + $0xc4] ss:$8 sps:$4 sm:$0xff]   ;;  %v2375_v47 = vld [vmem:[%s3264_s11 + $0xc0] ss:$8 sps:$4 sm:$0xff]  }
 0x107   : > { %1095 = vmatpush1.bf16.msra.mxu1 %v2328_v16  ;;  %1023 = vmatprep.subr.bf16.mxu0 %v2329_v17  ;;  %v2370_v44 = vld [vmem:[%s3264_s11 + $0x1d0] ss:$8 sps:$4 sm:$0xff]   ;;  %v2373_v46 = vld [vmem:[%s3264_s11 + $0x1c4] ss:$8 sps:$4 sm:$0xff]   ;;  %v2376_v48 = vld [vmem:[%s3264_s11 + $0x1c0] ss:$8 sps:$4 sm:$0xff]  }
 0x108   : > { %1096 = vmatprep.subr.bf16.mxu1 %v2331_v18  ;;  %v2377_v49 = vld [vmem:[%s3264_s11 + $0xb4] ss:$8 sps:$4 sm:$0xff]   ;;  %v2381_v53 = vld [vmem:[%s3264_s11 + $0xb0] ss:$8 sps:$4 sm:$0xff]   ;;  %v2383_v55 = vld [vmem:[%s3264_s11 + $0xa4] ss:$8 sps:$4 sm:$0xff]  }
 0x109   : > { %v2403_v50 = vld [vmem:[%s3256_s12 + $0x4] ss:$16 sps:$4 sm:$0xff]   ;;  %v2406_v52 = vld [vmem:[%s3256_s12 + $0xc] ss:$16 sps:$4 sm:$0xff]   ;;  %v2382_v54 = vld [vmem:[%s3264_s11 + $0x1b0] ss:$8 sps:$4 sm:$0xff]  }
 0x10a   : > { %1024 = vmatpush1.bf16.msra.mxu0 %v2333_v19  ;;  %v2379_v51 = vld [vmem:[%s3264_s11 + $0x1b4] ss:$8 sps:$4 sm:$0xff]   ;;  %1047 = vmatprep.mubr.bf16.mxu0 %v2403_v50  ;;  %v2385_v56 = vld [vmem:[%s3264_s11 + $0x1a4] ss:$8 sps:$4 sm:$0xff]   ;;  %v2387_v57 = vld [vmem:[%s3264_s11 + $0xa0] ss:$8 sps:$4 sm:$0xff]  }
 0x10b   : > { %1097 = vmatpush1.bf16.msra.mxu1 %v2334_v20  ;;  %1025 = vmatprep.subr.bf16.mxu0 %v2335_v21  ;;  %v2388_v58 = vld [vmem:[%s3264_s11 + $0x1a0] ss:$8 sps:$4 sm:$0xff]   ;;  %v2389_v59 = vld [vmem:[%s3264_s11 + $0x94] ss:$8 sps:$4 sm:$0xff]   ;;  %v2393_v61 = vld [vmem:[%s3264_s11 + $0x90] ss:$8 sps:$4 sm:$0xff]  }
 0x10c   : > { %1098 = vmatprep.subr.bf16.mxu1 %v2337_v22  ;;  %1120 = vmatprep.mubr.bf16.mxu1 %v2406_v52  ;;  %v2391_v60 = vld [vmem:[%s3264_s11 + $0x194] ss:$8 sps:$4 sm:$0xff]   ;;  %v2394_v62 = vld [vmem:[%s3264_s11 + $0x190] ss:$8 sps:$4 sm:$0xff]   ;;  %v2395_v63 = vld [vmem:[%s3264_s11 + $0x84] ss:$8 sps:$4 sm:$0xff]  }
 0x10d   : > { %v2397_v0 = vld [vmem:[%s3264_s11 + $0x184] ss:$8 sps:$4 sm:$0xff]   ;;  %v2399_v1 = vld [vmem:[%s3264_s11 + $0x80] ss:$8 sps:$4 sm:$0xff]   ;;  %v519_v18 = vld [vmem:[#allocation2 + $0x30] sm:$0xff]  ;;  %s3861_s24 = sld [smem:[#allocation32_spill]] }
 0x10e   : > { %1026 = vmatpush1.bf16.msra.mxu0 %v2339_v23  ;;  %v2400_v2 = vld [vmem:[%s3264_s11 + $0x180] ss:$8 sps:$4 sm:$0xff]   ;;  %v2407_v5 = vld [vmem:[%s3256_s12 + $0x24] ss:$16 sps:$4 sm:$0xff]   ;;  %v2409_v6 = vld [vmem:[%s3256_s12 + $0x2c] ss:$16 sps:$4 sm:$0xff]  }
 0x10f   : > { %1099 = vmatpush1.bf16.msra.mxu1 %v2340_v24  ;;  %1027 = vmatprep.subr.bf16.mxu0 %v2341_v25  ;;  %v2401_v3 = vld [vmem:[%s3256_s12] ss:$16 sps:$4 sm:$0xff]   ;;  %v2404_v4 = vld [vmem:[%s3256_s12 + $0x8] ss:$16 sps:$4 sm:$0xff]   ;;  %v2413_v9 = vld [vmem:[%s3256_s12 + $0x44] ss:$16 sps:$4 sm:$0xff]  }
 0x110   : > { %1100 = vmatprep.subr.bf16.mxu1 %v2343_v26  ;;  %v2411_v7 = vld [vmem:[%s3256_s12 + $0x20] ss:$16 sps:$4 sm:$0xff]   ;;  %v2412_v8 = vld [vmem:[%s3256_s12 + $0x28] ss:$16 sps:$4 sm:$0xff]   ;;  %v2415_v10 = vld [vmem:[%s3256_s12 + $0x4c] ss:$16 sps:$4 sm:$0xff]  }
 0x111   : > { %v2417_v11 = vld [vmem:[%s3256_s12 + $0x40] ss:$16 sps:$4 sm:$0xff]   ;;  %v2418_v12 = vld [vmem:[%s3256_s12 + $0x48] ss:$16 sps:$4 sm:$0xff]   ;;  %v2419_v13 = vld [vmem:[%s3256_s12 + $0x64] ss:$16 sps:$4 sm:$0xff]  }
 0x112   : > { %1028 = vmatpush1.bf16.msra.mxu0 %v2345_v27  ;;  %v2421_v14 = vld [vmem:[%s3256_s12 + $0x6c] ss:$16 sps:$4 sm:$0xff]   ;;  %v2423_v15 = vld [vmem:[%s3256_s12 + $0x60] ss:$16 sps:$4 sm:$0xff]   ;;  %v2424_v16 = vld [vmem:[%s3256_s12 + $0x68] ss:$16 sps:$4 sm:$0xff]  }
 0x113   : > { %1101 = vmatpush1.bf16.msra.mxu1 %v2346_v28  ;;  %1029 = vmatprep.subr.bf16.mxu0 %v2347_v29  ;;  %v520_v22 = vld [vmem:[#allocation2] sm:$0xff]  ;;  %v521_v27 = vld [vmem:[#allocation2 + $0x58] sm:$0xff]  ;;  %v526_v52 = vld [vmem:[#allocation2 + $0x48] sm:$0xff]  ;;  %p2052_p11 = scmp.ne.s32.totalorder %s3861_s24, 8 }
 0x114   : > { %1102 = vmatprep.subr.bf16.mxu1 %v2349_v30 }
 0x116   : > { %1030 = vmatpush1.bf16.msra.mxu0 %v2351_v31 }
 0x117   : > { %1103 = vmatpush1.bf16.msra.mxu1 %v2352_v32  ;;  %1031 = vmatprep.subr.bf16.mxu0 %v2353_v33  ;;  %v522_v32 = vld [vmem:[#allocation2 + $0x18] sm:$0xff] }
 0x118   : > { %1104 = vmatprep.subr.bf16.mxu1 %v2355_v34 }
 0x11a   : > { %1032 = vmatpush2.bf16.msra.mxu0 %v2357_v35 }
 0x11b   : > { %1105 = vmatpush2.bf16.msra.mxu1 %v2358_v36  ;;  %1033 = vmatprep.subr.bf16.mxu0 %v2359_v37  ;;  %v523_v37 = vld [vmem:[#allocation2 + $0x50] sm:$0xff] }
 0x11c   : > { %1106 = vmatprep.subr.bf16.mxu1 %v2361_v38 }
 0x11e   : > { %1034 = vmatpush2.bf16.msra.mxu0 %v2363_v39 }
 0x11f   : > { %1107 = vmatpush2.bf16.msra.mxu1 %v2364_v40  ;;  %1035 = vmatprep.subr.bf16.mxu0 %v2365_v41 }
 0x120   : > { %1108 = vmatprep.subr.bf16.mxu1 %v2367_v42  ;;  %v524_v42 = vld [vmem:[#allocation2 + $0x68] sm:$0xff] }
 0x122   : > { %1036 = vmatpush2.bf16.msra.mxu0 %v2369_v43 }
 0x123   : > { %1109 = vmatpush2.bf16.msra.mxu1 %v2370_v44  ;;  %1037 = vmatprep.subr.bf16.mxu0 %v2371_v45 }
 0x124   : > { %1110 = vmatprep.subr.bf16.mxu1 %v2373_v46 }
 0x126   : > { %1038 = vmatpush2.bf16.msra.mxu0 %v2375_v47  ;;  %v525_v47 = vld [vmem:[#allocation2 + $0x8] sm:$0xff] }
 0x127   : > { %1111 = vmatpush2.bf16.msra.mxu1 %v2376_v48  ;;  %1039 = vmatprep.subr.bf16.mxu0 %v2377_v49 }
 0x128   : > { %1112 = vmatprep.subr.bf16.mxu1 %v2379_v51 }
 0x12a   : > { %1040 = vmatpush2.bf16.msra.mxu0 %v2381_v53 }
 0x12b   : > { %1113 = vmatpush2.bf16.msra.mxu1 %v2382_v54  ;;  %1041 = vmatprep.subr.bf16.mxu0 %v2383_v55 }
 0x12c   : > { %1114 = vmatprep.subr.bf16.mxu1 %v2385_v56 }
 0x12e   : > { %1042 = vmatpush2.bf16.msra.mxu0 %v2387_v57  ;;  %v527_v57 = vld [vmem:[#allocation2 + $0x40] sm:$0xff] }
 0x12f   : > { %1115 = vmatpush2.bf16.msra.mxu1 %v2388_v58  ;;  %1043 = vmatprep.subr.bf16.mxu0 %v2389_v59 }
 0x130   : > { %1116 = vmatprep.subr.bf16.mxu1 %v2391_v60 }
 0x132   : > { %1044 = vmatpush2.bf16.msra.mxu0 %v2393_v61 }
 0x133   : > { %1117 = vmatpush2.bf16.msra.mxu1 %v2394_v62  ;;  %1045 = vmatprep.subr.bf16.mxu0 %v2395_v63  ;;  %v528_v62 = vld [vmem:[#allocation2 + $0x20] sm:$0xff] }
 0x134   : > { %1118 = vmatprep.subr.bf16.mxu1 %v2397_v0 }
 0x136   : > { %1046 = vmatpush2.bf16.msra.mxu0 %v2399_v1 }
 0x137   : > { %1119 = vmatpush2.bf16.msra.mxu1 %v2400_v2 }
 0x139   : > { %1048 = vmatmul.mubr.bf16.vlgmr.msra.gmra.mxu0 %v2401_v3  ;;  %v529_v3 = vld [vmem:[#allocation2 + $0x10] sm:$0xff] }
 0x13a   : > { %1121 = vmatmul.mubr.bf16.vlgmr.msra.gmra.mxu1 %v2404_v4  ;;  %1057 = vmatprep.mubr.bf16.mxu0 %v2407_v5 }
 0x13b   : > { %1130 = vmatprep.mubr.bf16.mxu1 %v2409_v6 }
 0x141   : > { %1058 = vmatmul.mubr.bf16.gmra.mxu0 %v2411_v7 }
 0x142   : > { %1131 = vmatmul.mubr.bf16.gmra.mxu1 %v2412_v8  ;;  %1067 = vmatprep.mubr.bf16.mxu0 %v2413_v9  ;;  %v530_v8 = vld [vmem:[#allocation2 + $0x38] sm:$0xff] }
 0x143   : > { %1140 = vmatprep.mubr.bf16.mxu1 %v2415_v10 }
 0x149   : > { %1068 = vmatmul.mubr.bf16.gmra.mxu0 %v2417_v11 }
 0x14a   : > { %1141 = vmatmul.mubr.bf16.gmra.mxu1 %v2418_v12  ;;  %1077 = vmatprep.mubr.bf16.mxu0 %v2419_v13  ;;  %v531_v13 = vld [vmem:[#allocation2 + $0x60] sm:$0xff] }
 0x14b   : > { %1150 = vmatprep.mubr.bf16.mxu1 %v2421_v14 }
 0x151   : > { %1078 = vmatmul.mubr.bf16.gmra.mxu0 %v2423_v15 }
 0x152   : > { %1151 = vmatmul.mubr.bf16.gmra.mxu1 %v2424_v16 }
 0x1f9   : > { %v1049_v17 = vpop.f32.mrf.mxu0 }
 0x1fa   : > { %v1122_v19 = vpop.f32.mrf.mxu1 }
 0x1fb   : > { %v1123_v20 = vadd.f32 %v1122_v19, %v1049_v17  ;;  %v1051_v21 = vpop.f32.mrf.mxu0 }
 0x1fc   : > { %v1124_v23 = vpop.f32.mrf.mxu1 }
 0x1fd   : > { %v1161_v24 = vadd.f32 %v1123_v20, %v519_v18  ;;  %v1125_v25 = vadd.f32 %v1124_v23, %v1051_v21  ;;  %v1053_v26 = vpop.f32.mrf.mxu0  ;;  %v532_v18 = vld [vmem:[#allocation2 + $0x70] sm:$0xff]  ;;  %v533_v23 = vld [vmem:[#allocation2 + $0x78] sm:$0xff] }
 0x1fe   : > { %v1126_v28 = vpop.f32.mrf.mxu1 }
 0x1ff   : > { %1177 = vst [vmem:[#allocation2 + $0x30] sm:$0xff] %v1161_v24  ;;  %v1162_v29 = vadd.f32 %v1125_v25, %v520_v22  ;;  %v1127_v30 = vadd.f32 %v1126_v28, %v1053_v26  ;;  %v1055_v31 = vpop.f32.mrf.mxu0  ;;  %v534_v28 = vld [vmem:[#allocation2 + $0x28] sm:$0xff] }
 0x200   : > { %v1128_v33 = vpop.f32.mrf.mxu1 }
 0x201   : > { %1178 = vst [vmem:[#allocation2] sm:$0xff] %v1162_v29  ;;  %v1163_v34 = vadd.f32 %v1127_v30, %v521_v27  ;;  %v1129_v35 = vadd.f32 %v1128_v33, %v1055_v31  ;;  %v1059_v36 = vpop.f32.mrf.mxu0 }
 0x202   : > { %v1132_v38 = vpop.f32.mrf.mxu1 }
 0x203   : > { %1179 = vst [vmem:[#allocation2 + $0x58] sm:$0xff] %v1163_v34  ;;  %v1164_v39 = vadd.f32 %v1129_v35, %v522_v32  ;;  %v1133_v40 = vadd.f32 %v1132_v38, %v1059_v36  ;;  %v1061_v41 = vpop.f32.mrf.mxu0 }
 0x204   : > { %v1134_v43 = vpop.f32.mrf.mxu1 }
 0x205   : > { %1180 = vst [vmem:[#allocation2 + $0x18] sm:$0xff] %v1164_v39  ;;  %v1165_v44 = vadd.f32 %v1133_v40, %v523_v37  ;;  %v1135_v45 = vadd.f32 %v1134_v43, %v1061_v41  ;;  %v1063_v46 = vpop.f32.mrf.mxu0 }
 0x206   : > { %v1136_v48 = vpop.f32.mrf.mxu1 }
 0x207   : > { %1181 = vst [vmem:[#allocation2 + $0x50] sm:$0xff] %v1165_v44  ;;  %v1166_v49 = vadd.f32 %v1135_v45, %v524_v42  ;;  %v1137_v50 = vadd.f32 %v1136_v48, %v1063_v46  ;;  %v1065_v51 = vpop.f32.mrf.mxu0 }
 0x208   : > { %v1138_v53 = vpop.f32.mrf.mxu1 }
 0x209   : > { %1182 = vst [vmem:[#allocation2 + $0x68] sm:$0xff] %v1166_v49  ;;  %v1167_v54 = vadd.f32 %v1137_v50, %v525_v47  ;;  %v1139_v55 = vadd.f32 %v1138_v53, %v1065_v51  ;;  %v1069_v56 = vpop.f32.mrf.mxu0 }
 0x20a   : > { %v1142_v58 = vpop.f32.mrf.mxu1 }
 0x20b   : > { %1183 = vst [vmem:[#allocation2 + $0x8] sm:$0xff] %v1167_v54  ;;  %v1168_v59 = vadd.f32 %v1139_v55, %v526_v52  ;;  %v1143_v60 = vadd.f32 %v1142_v58, %v1069_v56  ;;  %v1071_v61 = vpop.f32.mrf.mxu0 }
 0x20c   : > { %v1144_v63 = vpop.f32.mrf.mxu1 }
 0x20d   : > { %1184 = vst [vmem:[#allocation2 + $0x48] sm:$0xff] %v1168_v59  ;;  %v1169_v0 = vadd.f32 %v1143_v60, %v527_v57  ;;  %v1145_v1 = vadd.f32 %v1144_v63, %v1071_v61  ;;  %v1073_v2 = vpop.f32.mrf.mxu0 }
 0x20e   : > { %v1146_v4 = vpop.f32.mrf.mxu1 }
 0x20f   : > { %1185 = vst [vmem:[#allocation2 + $0x40] sm:$0xff] %v1169_v0  ;;  %v1170_v5 = vadd.f32 %v1145_v1, %v528_v62  ;;  %v1147_v6 = vadd.f32 %v1146_v4, %v1073_v2  ;;  %v1075_v7 = vpop.f32.mrf.mxu0 }
 0x210   : > { %v1148_v9 = vpop.f32.mrf.mxu1 }
 0x211   : > { %1186 = vst [vmem:[#allocation2 + $0x20] sm:$0xff] %v1170_v5  ;;  %v1171_v10 = vadd.f32 %v1147_v6, %v529_v3  ;;  %v1149_v11 = vadd.f32 %v1148_v9, %v1075_v7  ;;  %v1079_v12 = vpop.f32.mrf.mxu0 }
 0x212   : > { %v1152_v14 = vpop.f32.mrf.mxu1 }
 0x213   : > { %1187 = vst [vmem:[#allocation2 + $0x10] sm:$0xff] %v1171_v10  ;;  %v1172_v15 = vadd.f32 %v1149_v11, %v530_v8  ;;  %v1153_v16 = vadd.f32 %v1152_v14, %v1079_v12  ;;  %v1081_v17 = vpop.f32.mrf.mxu0 }
 0x214   : > { %v1154_v19 = vpop.f32.mrf.mxu1 }
 0x215   : > { %1188 = vst [vmem:[#allocation2 + $0x38] sm:$0xff] %v1172_v15  ;;  %v1173_v20 = vadd.f32 %v1153_v16, %v531_v13  ;;  %v1155_v21 = vadd.f32 %v1154_v19, %v1081_v17  ;;  %v1083_v22 = vpop.f32.mrf.mxu0 }
 0x216   : > { %v1156_v24 = vpop.f32.mrf.mxu1 }
 0x217   : > { %1189 = vst [vmem:[#allocation2 + $0x60] sm:$0xff] %v1173_v20  ;;  %v1174_v25 = vadd.f32 %v1155_v21, %v532_v18  ;;  %v1157_v26 = vadd.f32 %v1156_v24, %v1083_v22  ;;  %v1085_v27 = vpop.f32.mrf.mxu0 }
 0x218   : > { %v1158_v29 = vpop.f32.mrf.mxu1 }
 0x219   : > { %1190 = vst [vmem:[#allocation2 + $0x70] sm:$0xff] %v1174_v25  ;;  %v1175_v30 = vadd.f32 %v1157_v26, %v533_v23  ;;  %v1159_v31 = vadd.f32 %v1158_v29, %v1085_v27  ;;  %1196 = sbr.rel (%p2052_p11) target bundleno = 1098 (0x44a), region = 76 }
 0x21b   : > { %1191 = vst [vmem:[#allocation2 + $0x78] sm:$0xff] %v1175_v30  ;;  %v1176_v32 = vadd.f32 %v1159_v31, %v534_v28 }
 0x21d   : > { %1192 = vst [vmem:[#allocation2 + $0x28] sm:$0xff] %v1176_v32 }
 0x21e   : > { %v1247_v33 = vld [vmem:[%s3285_s27 + $0xf8] sm:$0xff]  ;;  %v1246_v34 = vld [vmem:[%s3285_s27 + $0xf0] sm:$0xff]  ;;  %v1245_v35 = vld [vmem:[%s3285_s27 + $0xe8] sm:$0xff]  ;;  %v1281_v49 = vlaneseq }
 0x21f   : > { %1333 = vmatprep.subr.mxu0 %v1247_v33  ;;  %v1244_v36 = vld [vmem:[%s3285_s27 + $0xe0] sm:$0xff]  ;;  %1473 = vmatprep.subr.mxu1 %v1247_v33  ;;  %v1243_v37 = vld [vmem:[%s3285_s27 + $0xd8] sm:$0xff]  ;;  %v1242_v38 = vld [vmem:[%s3285_s27 + $0xd0] sm:$0xff] }
 0x220   : > { %1334 = vmatpush1.msra.mxu0 %v1246_v34  ;;  %1474 = vmatpush1.msra.mxu1 %v1246_v34  ;;  %v1241_v39 = vld [vmem:[%s3285_s27 + $0xc8] sm:$0xff]  ;;  %v1240_v40 = vld [vmem:[%s3285_s27 + $0xc0] sm:$0xff]  ;;  %v1239_v41 = vld [vmem:[%s3285_s27 + $0xb8] sm:$0xff]  ;;  %v3398_v54 = vshrl.u32 %v1281_v49, 7 }
 0x221   : > { %1335 = vmatprep.subr.mxu0 %v1245_v35  ;;  %1475 = vmatprep.subr.mxu1 %v1245_v35  ;;  %v1238_v42 = vld [vmem:[%s3285_s27 + $0xb0] sm:$0xff]  ;;  %v1237_v43 = vld [vmem:[%s3285_s27 + $0xa8] sm:$0xff]  ;;  %v1236_v44 = vld [vmem:[%s3285_s27 + $0xa0] sm:$0xff] }
 0x222   : > { %1336 = vmatpush1.msra.mxu0 %v1244_v36  ;;  %1476 = vmatpush1.msra.mxu1 %v1244_v36  ;;  %v1235_v45 = vld [vmem:[%s3285_s27 + $0x98] sm:$0xff]  ;;  %v1234_v46 = vld [vmem:[%s3285_s27 + $0x90] sm:$0xff]  ;;  %v1233_v47 = vld [vmem:[%s3285_s27 + $0x88] sm:$0xff]  ;;  %v3405_v59 = vsub.s32 0, %v3398_v54  ;;  %v3408_v60 = vsub.s32 1, %v3398_v54 }
 0x223   : > { %1337 = vmatprep.subr.mxu0 %v1243_v37  ;;  %1477 = vmatprep.subr.mxu1 %v1243_v37  ;;  %v1232_v48 = vld [vmem:[%s3285_s27 + $0x80] sm:$0xff]  ;;  %v1231_v50 = vld [vmem:[%s3285_s27 + $0x78] sm:$0xff]  ;;  %v1230_v51 = vld [vmem:[%s3285_s27 + $0x70] sm:$0xff] }
 0x224   : > { %1338 = vmatpush1.msra.mxu0 %v1242_v38  ;;  %1478 = vmatpush1.msra.mxu1 %v1242_v38  ;;  %v1229_v52 = vld [vmem:[%s3285_s27 + $0x68] sm:$0xff]  ;;  %v1228_v53 = vld [vmem:[%s3285_s27 + $0x60] sm:$0xff]  ;;  %v1227_v55 = vld [vmem:[%s3285_s27 + $0x58] sm:$0xff] }
 0x225   : > { %1339 = vmatprep.subr.mxu0 %v1241_v39  ;;  %1479 = vmatprep.subr.mxu1 %v1241_v39  ;;  %v1226_v56 = vld [vmem:[%s3285_s27 + $0x50] sm:$0xff]  ;;  %v1225_v57 = vld [vmem:[%s3285_s27 + $0x48] sm:$0xff]  ;;  %v1224_v58 = vld [vmem:[%s3285_s27 + $0x40] sm:$0xff] }
 0x226   : > { %1340 = vmatpush1.msra.mxu0 %v1240_v40  ;;  %1480 = vmatpush1.msra.mxu1 %v1240_v40  ;;  %v1223_v61 = vld [vmem:[%s3285_s27 + $0x38] sm:$0xff]  ;;  %v1222_v62 = vld [vmem:[%s3285_s27 + $0x30] sm:$0xff]  ;;  %v1221_v63 = vld [vmem:[%s3285_s27 + $0x28] sm:$0xff] }
 0x227   : > { %1341 = vmatprep.subr.mxu0 %v1239_v41  ;;  %1481 = vmatprep.subr.mxu1 %v1239_v41  ;;  %v1198_v0 = vld [vmem:[#allocation2] sm:$0xff]  ;;  %v1200_v1 = vld [vmem:[#allocation2 + $0x18] sm:$0xff]  ;;  %v1202_v2 = vld [vmem:[#allocation2 + $0x68] sm:$0xff] }
 0x228   : > { %1342 = vmatpush1.msra.mxu0 %v1238_v42  ;;  %1482 = vmatpush1.msra.mxu1 %v1238_v42  ;;  %v1213_v3 = vld [vmem:[%s411_s4] sm:$0x3]  ;;  %v1220_v4 = vld [vmem:[%s3285_s27 + $0x20] sm:$0xff]  ;;  %v1219_v5 = vld [vmem:[%s3285_s27 + $0x18] sm:$0xff] }
 0x229   : > { %1343 = vmatprep.subr.mxu0 %v1237_v43  ;;  %1483 = vmatprep.subr.mxu1 %v1237_v43  ;;  %v1204_v6 = vld [vmem:[#allocation2 + $0x48] sm:$0xff]  ;;  %v3418_v7 = vrot.slane %v1213_v3, %v3405_v59  ;;  %v1288_v8 = vrot.slane %v1213_v3, %v3408_v60  ;;  %v1197_v9 = vld [vmem:[#allocation2 + $0x30] sm:$0xff]  ;;  %v1199_v10 = vld [vmem:[#allocation2 + $0x58] sm:$0xff] }
 0x22a   : > { %1344 = vmatpush1.msra.mxu0 %v1236_v44  ;;  %1484 = vmatpush1.msra.mxu1 %v1236_v44  ;;  %v1201_v11 = vld [vmem:[#allocation2 + $0x50] sm:$0xff]  ;;  %v1218_v12 = vld [vmem:[%s3285_s27 + $0x10] sm:$0xff]  ;;  %v1203_v19 = vld [vmem:[#allocation2 + $0x8] sm:$0xff] }
 0x22b   : > { %1345 = vmatprep.subr.mxu0 %v1235_v45  ;;  %1485 = vmatprep.subr.mxu1 %v1235_v45  ;;  %v1206_v13 = vld [vmem:[#allocation2 + $0x20] sm:$0xff]  ;;  %v3422_v14 = vadd.f32 %v1288_v8, %v1198_v0  ;;  %v3424_v15 = vadd.f32 %v1288_v8, %v1200_v1  ;;  %v3426_v16 = vadd.f32 %v1288_v8, %v1202_v2  ;;  %v1217_v17 = vld [vmem:[%s3285_s27 + $0x8] sm:$0xff]  ;;  %v1216_v20 = vld [vmem:[%s3285_s27] sm:$0xff] }
 0x22c   : > { %1346 = vmatpush1.msra.mxu0 %v1234_v46  ;;  %1486 = vmatpush1.msra.mxu1 %v1234_v46  ;;  %v3429_v18 = vadd.f32 %v1288_v8, %v1204_v6  ;;  %v1208_v21 = vld [vmem:[#allocation2 + $0x38] sm:$0xff]  ;;  %v3435_v23 = vadd.f32 %v3418_v7, %v1197_v9  ;;  %v3438_v24 = vadd.f32 %v3418_v7, %v1199_v10  ;;  %v1279_v26 = vld [vmem:[%s3285_s27 + $0x1f8] sm:$0xff]  ;;  %v1210_v30 = vld [vmem:[#allocation2 + $0x70] sm:$0xff] }
 0x22d   : > { %1347 = vmatprep.subr.mxu0 %v1233_v47  ;;  %1487 = vmatprep.subr.mxu1 %v1233_v47  ;;  %v1320_v22 = vadd.f32 %v3424_v15, %v3422_v14  ;;  %v3441_v25 = vadd.f32 %v3418_v7, %v1201_v11  ;;  %v3444_v27 = vadd.f32 %v1288_v8, %v1206_v13  ;;  %v1205_v28 = vld [vmem:[#allocation2 + $0x40] sm:$0xff]  ;;  %v1277_v34 = vld [vmem:[%s3285_s27 + $0x1e8] sm:$0xff]  ;;  %v1276_v37 = vld [vmem:[%s3285_s27 + $0x1e0] sm:$0xff] }
 0x22e   : > { %1348 = vmatpush1.msra.mxu0 %v1232_v48  ;;  %1488 = vmatpush1.msra.mxu1 %v1232_v48  ;;  %v1278_v29 = vld [vmem:[%s3285_s27 + $0x1f0] sm:$0xff]  ;;  %v3449_v32 = vadd.f32 %v3418_v7, %v1203_v19  ;;  %v1307_v33 = vadd.f32 %v3438_v24, %v3435_v23  ;;  %v3454_v35 = vadd.f32 %v1288_v8, %v1208_v21  ;;  %v1207_v36 = vld [vmem:[#allocation2 + $0x10] sm:$0xff]  ;;  %v1212_v38 = vld [vmem:[#allocation2 + $0x28] sm:$0xff] }
 0x22f   : > { %1349 = vmatprep.subr.mxu0 %v1231_v50  ;;  %1489 = vmatprep.subr.mxu1 %v1231_v50  ;;  %v1321_v31 = vadd.f32 %v1320_v22, %v3426_v16  ;;  %v3459_v40 = vadd.f32 %v3418_v7, %v1205_v28  ;;  %v1275_v42 = vld [vmem:[%s3285_s27 + $0x1d8] sm:$0xff]  ;;  %v3463_v43 = vadd.f32 %v1288_v8, %v1210_v30  ;;  %v1274_v45 = vld [vmem:[%s3285_s27 + $0x1d0] sm:$0xff]  ;;  %v1273_v49 = vld [vmem:[%s3285_s27 + $0x1c8] sm:$0xff] }
 0x230   : > { %1350 = vmatpush1.msra.mxu0 %v1230_v51  ;;  %1490 = vmatpush1.msra.mxu1 %v1230_v51  ;;  %v1308_v41 = vadd.f32 %v1307_v33, %v3441_v25  ;;  %v1209_v44 = vld [vmem:[#allocation2 + $0x60] sm:$0xff]  ;;  %v3468_v47 = vadd.f32 %v3418_v7, %v1207_v36  ;;  %v3472_v50 = vadd.f32 %v1288_v8, %v1212_v38  ;;  %v1211_v51 = vld [vmem:[#allocation2 + $0x78] sm:$0xff]  ;;  %v1268_v1 = vld [vmem:[%s3285_s27 + $0x1a0] sm:$0xff] }
 0x231   : > { %1351 = vmatprep.subr.mxu0 %v1229_v52  ;;  %1491 = vmatprep.subr.mxu1 %v1229_v52  ;;  %v1322_v39 = vadd.f32 %v1321_v31, %v3429_v18  ;;  %v1272_v52 = vld [vmem:[%s3285_s27 + $0x1c0] sm:$0xff]  ;;  %v1269_v0 = vld [vmem:[%s3285_s27 + $0x1a8] sm:$0xff]  ;;  %v1262_v13 = vld [vmem:[%s3285_s27 + $0x170] sm:$0xff] }
 0x232   : > { %1352 = vmatpush1.msra.mxu0 %v1228_v53  ;;  %1492 = vmatpush1.msra.mxu1 %v1228_v53  ;;  %v1309_v48 = vadd.f32 %v1308_v41, %v3449_v32  ;;  %v1265_v8 = vld [vmem:[%s3285_s27 + $0x188] sm:$0xff]  ;;  %v1264_v9 = vld [vmem:[%s3285_s27 + $0x180] sm:$0xff]  ;;  %v1259_v28 = vld [vmem:[%s3285_s27 + $0x158] sm:$0xff] }
 0x233   : > { %1353 = vmatprep.subr.mxu0 %v1227_v55  ;;  %1493 = vmatprep.subr.mxu1 %v1227_v55  ;;  %v1323_v46 = vadd.f32 %v1322_v39, %v3444_v27  ;;  %v3477_v55 = vadd.f32 %v3418_v7, %v1209_v44  ;;  %v1260_v21 = vld [vmem:[%s3285_s27 + $0x160] sm:$0xff]  ;;  %v1257_v31 = vld [vmem:[%s3285_s27 + $0x148] sm:$0xff]  ;;  %v1254_v38 = vld [vmem:[%s3285_s27 + $0x130] sm:$0xff] }
 0x234   : > { %1354 = vmatpush1.msra.mxu0 %v1226_v56  ;;  %1494 = vmatpush1.msra.mxu1 %v1226_v56  ;;  %v1310_v56 = vadd.f32 %v1309_v48, %v3459_v40  ;;  %v1256_v33 = vld [vmem:[%s3285_s27 + $0x140] sm:$0xff]  ;;  %v1253_v39 = vld [vmem:[%s3285_s27 + $0x128] sm:$0xff]  ;;  %v1251_v44 = vld [vmem:[%s3285_s27 + $0x118] sm:$0xff] }
 0x235   : > { %1355 = vmatprep.subr.mxu0 %v1225_v57  ;;  %1495 = vmatprep.subr.mxu1 %v1225_v57  ;;  %v1324_v53 = vadd.f32 %v1323_v46, %v3454_v35  ;;  %v1271_v57 = vld [vmem:[%s3285_s27 + $0x1b8] sm:$0xff]  ;;  %v1252_v41 = vld [vmem:[%s3285_s27 + $0x120] sm:$0xff]  ;;  %v1249_v46 = vld [vmem:[%s3285_s27 + $0x108] sm:$0xff] }
 0x236   : > { %1356 = vmatpush1.msra.mxu0 %v1224_v58  ;;  %1496 = vmatpush1.msra.mxu1 %v1224_v58  ;;  %v1270_v58 = vld [vmem:[%s3285_s27 + $0x1b0] sm:$0xff]  ;;  %v1248_v48 = vld [vmem:[%s3285_s27 + $0x100] sm:$0xff] }
 0x237   : > { %1357 = vmatprep.subr.mxu0 %v1223_v61  ;;  %1497 = vmatprep.subr.mxu1 %v1223_v61  ;;  %v1325_v61 = vadd.f32 %v1324_v53, %v3463_v43 }
 0x238   : > { %1358 = vmatpush1.msra.mxu0 %v1222_v62  ;;  %1498 = vmatpush1.msra.mxu1 %v1222_v62  ;;  %v3484_v62 = vadd.f32 %v3418_v7, %v1211_v51 }
 0x239   : > { %1359 = vmatprep.subr.mxu0 %v1221_v63  ;;  %1499 = vmatprep.subr.mxu1 %v1221_v63  ;;  %v1311_v63 = vadd.f32 %v1310_v56, %v3468_v47  ;;  %v1326_v2 = vadd.f32 %v1325_v61, %v3472_v50 }
 0x23a   : > { %1360 = vmatpush1.msra.mxu0 %v1220_v4  ;;  %1500 = vmatpush1.msra.mxu1 %v1220_v4  ;;  %v1267_v4 = vld [vmem:[%s3285_s27 + $0x198] sm:$0xff] }
 0x23b   : > { %1361 = vmatprep.subr.mxu0 %v1219_v5  ;;  %1501 = vmatprep.subr.mxu1 %v1219_v5  ;;  %v1312_v3 = vadd.f32 %v1311_v63, %v3477_v55  ;;  %v1266_v5 = vld [vmem:[%s3285_s27 + $0x190] sm:$0xff]  ;;  %v1327_v6 = vrot.slane %v1326_v2, 4 }
 0x23c   : > { %1362 = vmatpush1.msra.mxu0 %v1218_v12  ;;  %1502 = vmatpush1.msra.mxu1 %v1218_v12  ;;  %v1263_v12 = vld [vmem:[%s3285_s27 + $0x178] sm:$0xff] }
 0x23d   : > { %1363 = vmatprep.subr.mxu0 %v1217_v17  ;;  %1503 = vmatprep.subr.mxu1 %v1217_v17  ;;  %v1313_v7 = vadd.f32 %v1312_v3, %v3484_v62  ;;  %v1328_v10 = vadd.f32 %v1327_v6, %v1326_v2 }
 0x23e   : > { %1364 = vmatpush1.msra.mxu0 %v1216_v20  ;;  %1504 = vmatpush1.msra.mxu1 %v1216_v20  ;;  %v1261_v20 = vld [vmem:[%s3285_s27 + $0x168] sm:$0xff] }
 0x23f   : > { %1365 = vmatprep.subr.mxu0 %v1279_v26  ;;  %1505 = vmatprep.subr.mxu1 %v1279_v26  ;;  %v1314_v11 = vrot.slane %v1313_v7, 4  ;;  %v1329_v17 = vrot.slane %v1328_v10, 2 }
 0x240   : > { %1366 = vmatpush2.msra.mxu0 %v1278_v29  ;;  %1506 = vmatpush2.msra.mxu1 %v1278_v29  ;;  %v1258_v29 = vld [vmem:[%s3285_s27 + $0x150] sm:$0xff] }
 0x241   : > { %1367 = vmatprep.subr.mxu0 %v1277_v34  ;;  %1507 = vmatprep.subr.mxu1 %v1277_v34  ;;  %v1315_v19 = vadd.f32 %v1314_v11, %v1313_v7  ;;  %v1330_v22 = vadd.f32 %v1329_v17, %v1328_v10 }
 0x242   : > { %1368 = vmatpush2.msra.mxu0 %v1276_v37  ;;  %1508 = vmatpush2.msra.mxu1 %v1276_v37  ;;  %v1255_v37 = vld [vmem:[%s3285_s27 + $0x138] sm:$0xff] }
 0x243   : > { %1369 = vmatprep.subr.mxu0 %v1275_v42  ;;  %1509 = vmatprep.subr.mxu1 %v1275_v42  ;;  %v1316_v26 = vrot.slane %v1315_v19, 2  ;;  %v1331_v30 = vrot.slane %v1330_v22, 1 }
 0x244   : > { %1370 = vmatpush2.msra.mxu0 %v1274_v45  ;;  %1510 = vmatpush2.msra.mxu1 %v1274_v45  ;;  %v1250_v45 = vld [vmem:[%s3285_s27 + $0x110] sm:$0xff] }
 0x245   : > { %1371 = vmatprep.subr.mxu0 %v1273_v49  ;;  %1511 = vmatprep.subr.mxu1 %v1273_v49  ;;  %v1332_v34 = vadd.f32 %v1331_v30, %v1330_v22  ;;  %v1317_v36 = vadd.f32 %v1316_v26, %v1315_v19 }
 0x246   : > { %1372 = vmatpush2.msra.mxu0 %v1272_v52  ;;  %1512 = vmatpush2.msra.mxu1 %v1272_v52 }
 0x247   : > { %1373 = vmatprep.subr.mxu0 %v1271_v57  ;;  %1513 = vmatprep.subr.mxu1 %v1271_v57  ;;  %v1318_v42 = vrot.slane %v1317_v36, 1 }
 0x248   : > { %1374 = vmatpush2.msra.mxu0 %v1270_v58  ;;  %1514 = vmatpush2.msra.mxu1 %v1270_v58 }
 0x249   : > { %1375 = vmatprep.subr.mxu0 %v1269_v0  ;;  %1515 = vmatprep.subr.mxu1 %v1269_v0  ;;  %v1319_v49 = vadd.f32 %v1318_v42, %v1317_v36 }
 0x24a   : > { %1376 = vmatpush2.msra.mxu0 %v1268_v1  ;;  %1516 = vmatpush2.msra.mxu1 %v1268_v1 }
 0x24b   : > { %1377 = vmatprep.subr.mxu0 %v1267_v4  ;;  %1517 = vmatprep.subr.mxu1 %v1267_v4 }
 0x24c   : > { %1378 = vmatpush2.msra.mxu0 %v1266_v5  ;;  %1518 = vmatpush2.msra.mxu1 %v1266_v5 }
 0x24d   : > { %1379 = vmatprep.subr.mxu0 %v1265_v8  ;;  %1519 = vmatprep.subr.mxu1 %v1265_v8 }
 0x24e   : > { %1380 = vmatpush2.msra.mxu0 %v1264_v9  ;;  %1520 = vmatpush2.msra.mxu1 %v1264_v9 }
 0x24f   : > { %1381 = vmatprep.subr.mxu0 %v1263_v12  ;;  %1521 = vmatprep.subr.mxu1 %v1263_v12 }
 0x250   : > { %1382 = vmatpush2.msra.mxu0 %v1262_v13  ;;  %1397 = vmatprep.mubr.f32.mxu0 %v1332_v34 }
 0x251   : > { %1383 = vmatprep.subr.mxu0 %v1261_v20  ;;  %1522 = vmatpush2.msra.mxu1 %v1262_v13 }
 0x252   : > { %1384 = vmatpush2.msra.mxu0 %v1260_v21  ;;  %1523 = vmatprep.subr.mxu1 %v1261_v20 }
 0x253   : > { %1385 = vmatprep.subr.mxu0 %v1259_v28  ;;  %1524 = vmatpush2.msra.mxu1 %v1260_v21 }
 0x254   : > { %1386 = vmatpush2.msra.mxu0 %v1258_v29  ;;  %1525 = vmatprep.subr.mxu1 %v1259_v28 }
 0x255   : > { %1387 = vmatprep.subr.mxu0 %v1257_v31  ;;  %1526 = vmatpush2.msra.mxu1 %v1258_v29 }
 0x256   : > { %1388 = vmatpush2.msra.mxu0 %v1256_v33  ;;  %1527 = vmatprep.subr.mxu1 %v1257_v31 }
 0x257   : > { %1389 = vmatprep.subr.mxu0 %v1255_v37  ;;  %1528 = vmatpush2.msra.mxu1 %v1256_v33 }
 0x258   : > { %1390 = vmatpush2.msra.mxu0 %v1254_v38  ;;  %1529 = vmatprep.subr.mxu1 %v1255_v37 }
 0x259   : > { %1391 = vmatprep.subr.mxu0 %v1253_v39  ;;  %1530 = vmatpush2.msra.mxu1 %v1254_v38 }
 0x25a   : > { %1392 = vmatpush2.msra.mxu0 %v1252_v41  ;;  %1531 = vmatprep.subr.mxu1 %v1253_v39 }
 0x25b   : > { %1393 = vmatprep.subr.mxu0 %v1251_v44  ;;  %1532 = vmatpush2.msra.mxu1 %v1252_v41 }
 0x25c   : > { %1394 = vmatpush2.msra.mxu0 %v1250_v45  ;;  %1533 = vmatprep.subr.mxu1 %v1251_v44 }
 0x25d   : > { %1395 = vmatprep.subr.mxu0 %v1249_v46  ;;  %1534 = vmatpush2.msra.mxu1 %v1250_v45 }
 0x25e   : > { %1396 = vmatpush2.msra.mxu0 %v1248_v48  ;;  %1535 = vmatprep.subr.mxu1 %v1249_v46 }
 0x25f   : > { %1398 = vmatmul.mubr.f32.vlgmr.msra.gmra.mxu0 %v1319_v49  ;;  %1536 = vmatpush2.msra.mxu1 %v1248_v48 }
 0x31f   : > { %v1399_v51 = vpop.f32.mrf.mxu0 }
 0x320   : > { %v1405_v52 = vmul.f32 0.0009765625, %v1399_v51 }
 0x321   : > { %v1401_v53 = vpop.f32.mrf.mxu0 }
 0x322   : > { %v1410_v56 = vrot.slane %v1405_v52, %v3405_v59  ;;  %v1406_v57 = vmul.f32 0.0009765625, %v1401_v53 }
 0x324   : > { %v1414_v58 = vrot.slane %v1406_v57, %v3405_v59  ;;  %v3515_v61 = vsub.f32 %v3435_v23, %v1410_v56  ;;  %v3527_v2 = vsub.f32 %v3438_v24, %v1410_v56  ;;  %v3565_v11 = vsub.f32 %v3468_v47, %v1410_v56 }
 0x325   : > { %v3575_v19 = vsub.f32 %v3477_v55, %v1410_v56  ;;  %v3584_v28 = vsub.f32 %v3484_v62, %v1410_v56 }
 0x326   : > { %v3518_v63 = vsub.f32 %v3422_v14, %v1414_v58  ;;  %v3521_v0 = vsub.f32 %v3424_v15, %v1414_v58  ;;  %v3524_v1 = vsub.f32 %v3426_v16, %v1414_v58  ;;  %v3530_v3 = vsub.f32 %v3429_v18, %v1414_v58 }
 0x327   : > { %v3537_v14 = vsub.f32 %v3441_v25, %v1410_v56  ;;  %v3540_v15 = vsub.f32 %v3444_v27, %v1414_v58  ;;  %v3543_v16 = vsub.f32 %v3449_v32, %v1410_v56  ;;  %v1431_v5 = vmul.f32 %v3515_v61, %v3515_v61 }
 0x328   : > { %v1432_v4 = vmul.f32 %v3518_v63, %v3518_v63  ;;  %v1434_v23 = vmul.f32 %v3521_v0, %v3521_v0  ;;  %v1436_v24 = vmul.f32 %v3524_v1, %v3524_v1  ;;  %v1433_v6 = vmul.f32 %v3527_v2, %v3527_v2 }
 0x329   : > { %v3552_v7 = vsub.f32 %v3454_v35, %v1414_v58  ;;  %v3555_v25 = vsub.f32 %v3459_v40, %v1410_v56  ;;  %v1438_v27 = vmul.f32 %v3530_v3, %v3530_v3  ;;  %v1435_v8 = vmul.f32 %v3537_v14, %v3537_v14 }
 0x32a   : > { %v1460_v18 = vadd.f32 %v1434_v23, %v1432_v4  ;;  %v1447_v9 = vadd.f32 %v1433_v6, %v1431_v5  ;;  %v3562_v10 = vsub.f32 %v3463_v43, %v1414_v58  ;;  %v1440_v35 = vmul.f32 %v3540_v15, %v3540_v15 }
 0x32b   : > { %v1437_v40 = vmul.f32 %v3543_v16, %v3543_v16  ;;  %v3572_v17 = vsub.f32 %v3472_v50, %v1414_v58  ;;  %v1442_v43 = vmul.f32 %v3552_v7, %v3552_v7  ;;  %v1439_v47 = vmul.f32 %v3555_v25, %v3555_v25 }
 0x32c   : > { %v1461_v32 = vadd.f32 %v1460_v18, %v1436_v24  ;;  %v1448_v13 = vadd.f32 %v1447_v9, %v1435_v8  ;;  %v1444_v22 = vmul.f32 %v3562_v10, %v3562_v10  ;;  %v1441_v50 = vmul.f32 %v3565_v11, %v3565_v11 }
 0x32d   : > { %v1446_v29 = vmul.f32 %v3572_v17, %v3572_v17  ;;  %v1443_v31 = vmul.f32 %v3575_v19, %v3575_v19  ;;  %v1445_v36 = vmul.f32 %v3584_v28, %v3584_v28  ;;  %v2837_v5 = vmov 1966171168  }
 0x32e   : > { %v1462_v12 = vadd.f32 %v1461_v32, %v1438_v27  ;;  %v1449_v21 = vadd.f32 %v1448_v13, %v1437_v40  ;;  %v1569_v6 = vunpack.c.l.s4 %v2837_v5 }
 0x330   : > { %v1463_v20 = vadd.f32 %v1462_v12, %v1440_v35  ;;  %v1450_v55 = vadd.f32 %v1449_v21, %v1439_v47  ;;  %v1570_v12 = vunpack.c.0.s8 %v1569_v6 }
 0x332   : > { %v1464_v26 = vadd.f32 %v1463_v20, %v1442_v43  ;;  %v1451_v33 = vadd.f32 %v1450_v55, %v1441_v50 }
 0x334   : > { %v1465_v30 = vadd.f32 %v1464_v26, %v1444_v22  ;;  %v1452_v37 = vadd.f32 %v1451_v33, %v1443_v31  ;;  %v1573_v22 = vsub.s32 %v1570_v12, %v3398_v54  ;;  %v1215_v31 = vld [vmem:[%s429_s5] sm:$0x3] }
 0x336   : > { %v1466_v34 = vadd.f32 %v1465_v30, %v1446_v29  ;;  %v1453_v62 = vadd.f32 %v1452_v37, %v1445_v36  ;;  %v1214_v29 = vld [vmem:[%s420_s21] sm:$0x3]  ;;  %v1616_v37 = vrot.slane %v1215_v31, %v3405_v59 }
 0x338   : > { %v1467_v38 = vrot.slane %v1466_v34, 4  ;;  %v1454_v41 = vrot.slane %v1453_v62, 4 }
 0x33a   : > { %v1468_v39 = vadd.f32 %v1467_v38, %v1466_v34  ;;  %v1455_v44 = vadd.f32 %v1454_v41, %v1453_v62  ;;  %v1620_v38 = vrot.slane %v1215_v31, %v3408_v60 }
 0x33c   : > { %v1469_v42 = vrot.slane %v1468_v39, 2  ;;  %v1456_v46 = vrot.slane %v1455_v44, 2 }
 0x33e   : > { %v1470_v45 = vadd.f32 %v1469_v42, %v1468_v39  ;;  %v1457_v49 = vadd.f32 %v1456_v46, %v1455_v44 }
 0x340   : > { %v1471_v48 = vrot.slane %v1470_v45, 1  ;;  %v1458_v52 = vrot.slane %v1457_v49, 1 }
 0x342   : > { %v1472_v51 = vadd.f32 %v1471_v48, %v1470_v45  ;;  %v1459_v53 = vadd.f32 %v1458_v52, %v1457_v49 }
 0x344   : > { %1537 = vmatprep.mubr.f32.mxu1 %v1472_v51 }
 0x345   : > { %1538 = vmatmul.mubr.f32.vlgmr.msra.gmra.mxu1 %v1459_v53 }
 0x405   : > { %v1539_v56 = vpop.f32.mrf.mxu1 }
 0x406   : > { %v1545_v57 = vmul.f32 0.0009775171, %v1539_v56 }
 0x407   : > { %v1541_v58 = vpop.f32.mrf.mxu1 }
 0x408   : > { %v1547_v4 = vmax.f32 %v1545_v57, 0.0  ;;  %v1546_v23 = vmul.f32 0.0009775171, %v1541_v58 }
 0x40a   : > { %2425 = vrsqrt.f32 %v1547_v4  ;;  %v1548_v24 = vmax.f32 %v1546_v23, 0.0  ;;  %vm1551_vm0 = vcmp.eq.f32.partialorder %v1547_v4, inf  ;;  %v1554_v9 = vand.u32 2147483648, %v1547_v4 }
 0x40b   : > { %vm1553_vm1 = vcmp.eq.f32.partialorder %v1547_v4, 0.0 }
 0x40c   : > { %2427 = vrsqrt.f32 %v1548_v24  ;;  %vm1558_vm2 = vcmp.eq.f32.partialorder %v1548_v24, inf  ;;  %v1561_v13 = vand.u32 2147483648, %v1548_v24  ;;  %vm1560_vm3 = vcmp.eq.f32.partialorder %v1548_v24, 0.0 }
 0x417   : > { %v2426_v18 = vpop.eup %2425 }
 0x418   : > { %v1550_v27 = vmul.f32 %v2426_v18, %v1547_v4 }
 0x419   : > { %v2428_v32 = vpop.eup %2427 }
 0x41a   : > { %v1552_v8 = vsel %vm1551_vm0, %v1547_v4, %v1550_v27  ;;  %v1557_v35 = vmul.f32 %v2428_v32, %v1548_v24 }
 0x41b   : > { %v1555_v40 = vsel %vm1553_vm1, %v1554_v9, %v1552_v8 }
 0x41c   : > { %v1559_v43 = vsel %vm1558_vm2, %v1548_v24, %v1557_v35  ;;  %v1563_v47 = vadd.f32 1e-10, %v1555_v40 }
 0x41d   : > { %v1562_v20 = vsel %vm1560_vm3, %v1561_v13, %v1559_v43 }
 0x41e   : > { %v1564_v21 = vadd.f32 1e-10, %v1562_v20 }
 0x420   : > { %v1567_v26 = vcombine.low %v1563_v47, %v1564_v21 }
 0x422   : > { %v1574_v50 = vrot.slane %v1567_v26, %v1573_v22 }
 0x424   : > { %v1581_v55 = vrot.slane %v1574_v50, %v1573_v22 }
 0x426   : > { %2429 = vrcp.f32 %v1581_v55 }
 0x433   : > { %v2430_v30 = vpop.eup %2429 }
 0x434   : > { %v1584_v33 = vmul.f32 %v2430_v30, %v1214_v29 }
 0x436   : > { %v1589_v34 = vrot.slane %v1584_v33, %v3405_v59  ;;  %v1593_v36 = vrot.slane %v1584_v33, %v3408_v60 }
 0x438   : > { %v1596_v54 = vmul.f32 %v1589_v34, %v3515_v61  ;;  %v1597_v62 = vmul.f32 %v1593_v36, %v3518_v63  ;;  %v1598_v39 = vmul.f32 %v1589_v34, %v3527_v2  ;;  %v1599_v41 = vmul.f32 %v1593_v36, %v3521_v0 }
 0x439   : > { %v1600_v42 = vmul.f32 %v1589_v34, %v3537_v14  ;;  %v1601_v44 = vmul.f32 %v1593_v36, %v3524_v1  ;;  %v1602_v45 = vmul.f32 %v1589_v34, %v3543_v16  ;;  %v1603_v46 = vmul.f32 %v1593_v36, %v3530_v3 }
 0x43a   : > { %v1604_v59 = vmul.f32 %v1589_v34, %v3555_v25  ;;  %v1605_v60 = vmul.f32 %v1593_v36, %v3540_v15  ;;  %v1606_v61 = vmul.f32 %v1589_v34, %v3565_v11  ;;  %v1607_v63 = vmul.f32 %v1593_v36, %v3552_v7 }
 0x43b   : > { %v1608_v2 = vmul.f32 %v1589_v34, %v3575_v19  ;;  %v1609_v0 = vmul.f32 %v1593_v36, %v3562_v10  ;;  %v1610_v14 = vmul.f32 %v1589_v34, %v3584_v28  ;;  %v1611_v1 = vmul.f32 %v1593_v36, %v3572_v17 }
 0x43c   : > { %v1623_v48 = vadd.f32 %v1616_v37, %v1596_v54  ;;  %v1624_v16 = vadd.f32 %v1620_v38, %v1597_v62  ;;  %v1625_v49 = vadd.f32 %v1616_v37, %v1598_v39  ;;  %v1626_v3 = vadd.f32 %v1620_v38, %v1599_v41 }
 0x43d   : > { %v1627_v51 = vadd.f32 %v1616_v37, %v1600_v42  ;;  %v1628_v25 = vadd.f32 %v1620_v38, %v1601_v44  ;;  %v1629_v52 = vadd.f32 %v1616_v37, %v1602_v45  ;;  %v1630_v15 = vadd.f32 %v1620_v38, %v1603_v46 }
 0x43e   : > { %v1631_v53 = vadd.f32 %v1616_v37, %v1604_v59  ;;  %v1632_v11 = vadd.f32 %v1620_v38, %v1605_v60  ;;  %v1633_v56 = vadd.f32 %v1616_v37, %v1606_v61  ;;  %v1634_v7 = vadd.f32 %v1620_v38, %v1607_v63 }
 0x43f   : > { %v1635_v57 = vadd.f32 %v1616_v37, %v1608_v2  ;;  %v1636_v19 = vadd.f32 %v1620_v38, %v1609_v0  ;;  %v1637_v58 = vadd.f32 %v1616_v37, %v1610_v14  ;;  %v1638_v10 = vadd.f32 %v1620_v38, %v1611_v1 }
 0x440   : > { %v1639_v4 = vmax.f32 %v1623_v48, 0.0  ;;  %v1640_v28 = vmax.f32 %v1624_v16, 0.0  ;;  %v1641_v23 = vmax.f32 %v1625_v49, 0.0  ;;  %v1642_v17 = vmax.f32 %v1626_v3, 0.0 }
 0x441   : > { %v1643_v24 = vmax.f32 %v1627_v51, 0.0  ;;  %v1644_v18 = vmax.f32 %v1628_v25, 0.0  ;;  %v1645_v5 = vmax.f32 %v1629_v52, 0.0  ;;  %v1646_v6 = vmax.f32 %v1630_v15, 0.0 }
 0x442   : > { %v1647_v27 = vmax.f32 %v1631_v53, 0.0  ;;  %v1648_v32 = vmax.f32 %v1632_v11, 0.0  ;;  %v1649_v8 = vmax.f32 %v1633_v56, 0.0  ;;  %v1650_v9 = vmax.f32 %v1634_v7, 0.0 }
 0x443   : > { %v1651_v35 = vmax.f32 %v1635_v57, 0.0  ;;  %v1652_v12 = vmax.f32 %v1636_v19, 0.0  ;;  %v1653_v40 = vmax.f32 %v1637_v58, 0.0  ;;  %v1654_v13 = vmax.f32 %v1638_v10, 0.0 }
 0x444   : > { %v2071_v43 = vpack.c.bf16 %v1640_v28, %v1639_v4  ;;  %v2072_v20 = vpack.c.bf16 %v1642_v17, %v1641_v23  ;;  %v2073_v47 = vpack.c.bf16 %v1644_v18, %v1643_v24  ;;  %v2074_v21 = vpack.c.bf16 %v1646_v6, %v1645_v5 }
 0x445   : > { %v2075_v22 = vpack.c.bf16 %v1648_v32, %v1647_v27  ;;  %v2076_v26 = vpack.c.bf16 %v1650_v9, %v1649_v8  ;;  %v2077_v50 = vpack.c.bf16 %v1652_v12, %v1651_v35  ;;  %v2078_v55 = vpack.c.bf16 %v1654_v13, %v1653_v40 }
 0x446   : > { %1703 = vst [vmem:[%s3294_s9] sm:$0xff] %v2071_v43  ;;  %1704 = vst [vmem:[%s3294_s9 + $0x8] sm:$0xff] %v2072_v20 }
 0x447   : > { %1705 = vst [vmem:[%s3294_s9 + $0x10] sm:$0xff] %v2073_v47  ;;  %1706 = vst [vmem:[%s3294_s9 + $0x18] sm:$0xff] %v2074_v21 }
 0x448   : > { %1707 = vst [vmem:[%s3294_s9 + $0x20] sm:$0xff] %v2075_v22  ;;  %1708 = vst [vmem:[%s3294_s9 + $0x28] sm:$0xff] %v2076_v26 }
 0x449   : > { %1709 = vst [vmem:[%s3294_s9 + $0x30] sm:$0xff] %v2077_v50  ;;  %1710 = vst [vmem:[%s3294_s9 + $0x38] sm:$0xff] %v2078_v55 }
 0x44a PF: > { %s3862_s12 = sld [smem:[#allocation33_spill]]  ;;  %s1727_s2 = sshll.u32 %s3294_s9, 4  ;;  %s3630_s2 = int_to_ptr.vmem [resolvable:$true] %s1727_s2 }
 0x44b   : > { %s3863_s19 = sld [smem:[#allocation34_spill]]  ;;  %s3639_s8 = scalar_lea.sflag [#allocation5], %s489_s30 }
 0x44c   : > { %s3865_s28 = sld [smem:[#allocation30_spill]]  ;;  %s2599_s25 = scalar_lea.vmem %s3630_s2, 1024 }
 0x44d   : > { %s3866_s6 = sld [smem:[#allocation53_spill]]  ;;  %p2600_p13 = scmp.ne.s32.totalorder %s3630_s2, %s2599_s25 }
 0x44e   : > { %s2838_s23 = smov [#allocation14]  }
 0x44f   : > { %s2603_s5 = sshll.u32 %s2838_s23, 4  ;;  %s2604_s5 = int_to_ptr.vmem [resolvable:$false] %s2603_s5 }
 0x450   : > { %s2062_s14 = sshll.u32 %s3862_s12, 1  ;;  %s2605_s3 = scalar_lea.vmem %s2604_s5, 2048 }
 0x451   : > { %s2063_s11 = sshll.u32 %s3863_s19, 5  ;;  %p2606_p2 = scmp.lt.s32.totalorder %s3630_s2, %s2604_s5 }
 0x452   : > { %s1724_s13 = sadd.s32 %s2063_s11, %s2062_s14  ;;  %p3867_p3 = scmp.ne.s32.totalorder %s3865_s28, 0 }
 0x453   : > { %s2064_s22 = sshll.u32 %s1724_s13, 6  ;;  %p2607_p6 = scmp.lt.s32.totalorder %s2605_s3, %s2599_s25 }
 0x454   : > { %s3635_s21 = scalar_lea.hbm %s3866_s6, %s2064_s22  ;;  %p2601_p5 = pnand %p2600_p13, %p3867_p3 }
 0x455   : > { %p2608_p7 = por %p2607_p6, %p2606_p2 }
 0x456   : > { %p2602_p12 = pneg %p2601_p5 }
 0x458   : > { %p2609_p1 = pnand %p2608_p7, %p2602_p12 }
 0x45a   : > { %2612 = shalt.err (!%p2609_p1)
}
 0x45b   : > { %s2613_s27 = scalar_lea.hbm %s3635_s21, 1024  ;;  %s2617_s29 = scalar_lea.hbm %s3866_s6, 4096 }
 0x45c   : > { %p2614_p9 = scmp.ne.s32.totalorder %s3635_s21, %s2613_s27  ;;  %p2618_p8 = scmp.lt.s32.totalorder %s3635_s21, %s3866_s6 }
 0x45d   : > { %p2619_p0 = scmp.lt.s32.totalorder %s2617_s29, %s2613_s27 }
 0x45e   : > { %p2615_p4 = pnand %p2614_p9, %p3867_p3 }
 0x45f   : > { %p2620_p11 = por %p2619_p0, %p2618_p8 }
 0x460   : > { %p2616_p10 = pneg %p2615_p4 }
 0x462   : > { %p2621_p13 = pnand %p2620_p11, %p2616_p10 }
 0x464   : > { %2624 = shalt.err (!%p2621_p13)
}
 0x465   : > { %s2839_s24 = smov 128   ;;  %s2840_s12 = smov 256  }
 0x466   : > { %s2841_s19 = smov 8  }
 0x467   : > { %2092 = dma.vmem_to_hbm [thread:$0]  (%p3867_p3), %s3630_s2, 1024, %s3635_s21, %s3639_s8, %s2839_s24, %s2840_s12, %s2841_s19  }
 0x468 PF: > { %s3868_s26 = sld [smem:[#allocation21_spill]]  ;;  %p2118_p5 = scmp.ge.s32.totalorder %s2823_s18, 2 }
 0x469   : > { %s3869_s14 = sld [smem:[#allocation38_spill]] }
 0x46e   : > { %s1742_s11 = sand.u32 1, %s3868_s26  }
 0x46f   : > { %p3870_p12 = scmp.ne.s32.totalorder %s3869_s14, 0  ;;  %s1743_s13 = scalar_lea.sflag [#allocation5], %s1742_s11 }
 0x471   : > { %p2114_p2 = pnand %p2118_p5, %p3870_p12 }
 0x473   : > { %p2115_p6 = pneg %p2114_p2 }
 0x475   : > { %2734 = dma.done.wait (%p2115_p6), %s1743_s13, 1024  }
 0x476   : > { %2736 = vsyncadd (%p2115_p6), %s1743_s13, 4294966272  ;;  %s31_s18 = sadd.s32 1, %s2823_s18   ;;  %s3873_s21 = sld [smem:[#allocation22_spill]] }
 0x477   : > { %p3667_p7 = scmp.ge.s32.totalorder %s31_s18, 38   ;;  %s3874_s22 = sld [smem:[#allocation23_spill]] }
 0x478   : > { %s3875_s23 = sld [smem:[#allocation46_spill]]  ;;  %s3890_s26 = smov %s3910_s1 }
 0x479   : > { %s3876_s24 = sld [smem:[#allocation25_spill]]  ;;  %s3892_s30 = smov %s2779_s7 }
 0x47a   : > { %s3877_s25 = sld [smem:[#allocation26_spill]]  ;;  %s3894_s9 = smov %s2791_s10 }
 0x47b   : > { %s3878_s27 = sld [smem:[#allocation27_spill]]  ;;  %s3896_s13 = smov %s2815_s16 }
 0x47c   : > { %s3879_s28 = sld [smem:[#allocation28_spill]] }
 0x47d   : > { %s3880_s29 = sld [smem:[#allocation42_spill]] }
 0x47e   : > { %s3881_s2 = sld [smem:[#allocation29_spill]] }
 0x47f   : > { %s3882_s8 = sld [smem:[#allocation40_spill]] }
 0x480   : > { %s3883_s4 = sld [smem:[#allocation31_spill]] }
 0x481   : > { %s3884_s11 = sld [smem:[#allocation45_spill]] }
 0x482   : > { %s3885_s12 = sld [smem:[#allocation35_spill]] }
 0x483   : > { %s3886_s14 = sld [smem:[#allocation36_spill]] }
 0x484   : > { %s3887_s5 = sld [smem:[#allocation37_spill]]  ;;  %s3893_s7 = smov %s3881_s2 }
 0x485   : > { %s3888_s3 = sld [smem:[#allocation39_spill]] }
 0x486   : > { %s3889_s17 = sld [smem:[#allocation44_spill]]  ;;  %s3895_s10 = smov %s3883_s4 }
 0x487   :  { %30 = sbr.rel (!%p3667_p7) target bundleno = 28 (0x1c), region = 158 }
 0x48a   : > { %s3897_s15 = smov %s3887_s5 }
 0x48b   : > { %s3898_s16 = smov %s3888_s3 }
 0x48c   :  { %1748 = vsyncpa [#allocation4], 1 }
 0x48d   :  { %1750 = vsyncpa [#allocation4 + $0x1], 1 }
 0x48e   :  { %1751 = vsyncpa [#allocation7], 1 }
 0x48f   :  { %1753 = vsyncpa [#allocation7 + $0x1], 1 }
 0x490   :  { %1754 = vsyncpa [#allocation10], 1 }
 0x491   :  { %1756 = vsyncpa [#allocation10 + $0x1], 1 }
 0x492   :  { %1757 = vsyncpa [#allocation13], 1 }
 0x493   :  { %1759 = vsyncpa [#allocation13 + $0x1], 1 }
 0x494   :  { %1760 = vsyncpa [#allocation5], 1 }
 0x495   :  { %1762 = vsyncpa [#allocation5 + $0x1], 1 }

</bundles_post_ra>
